<compile_context>
chip_gen: v6e
topology: v6e:2x2x1
jax: 0.10.0
libtpu: 0.0.40
codegen_flags: <defaults>
</compile_context>

<pallas_src>
import math

import numpy as np
import jax
import jax.numpy as jnp
from jax.experimental import pallas as pl
from jax.experimental.pallas import tpu as pltpu


# ----------------------------------------------------------------------------
# Hardware budget (VMEM capacity / #TensorCores), queried lazily, cached.
# ----------------------------------------------------------------------------
_TPU_BUDGET_CACHE = None


def _tpu_budget():
    global _TPU_BUDGET_CACHE
    if _TPU_BUDGET_CACHE is not None:
        return _TPU_BUDGET_CACHE
    vmem_cap = 64 * 1024 * 1024          # conservative default = v7x per-TC
    num_cores = 1
    try:
        info = pltpu.get_tpu_info()
        cap = getattr(info, "vmem_capacity_bytes", None)
        if cap:
            vmem_cap = int(cap)
    except Exception:
        pass
    try:
        dev = jax.devices()[0]
        kind = str(getattr(dev, "device_kind", "")).lower()
        if "v7" in kind:
            num_cores = 2
        nc = getattr(dev, "num_cores", None)
        if isinstance(nc, int) and nc > num_cores:
            num_cores = nc
    except Exception:
        pass
    _TPU_BUDGET_CACHE = (vmem_cap, num_cores)
    return _TPU_BUDGET_CACHE


# ----------------------------------------------------------------------------
# Pallas kernels
# ----------------------------------------------------------------------------
def _make_resize_kernel():
    """Separable bilinear resize of a block of G images, two MXU matmuls.

    ry_bd_ref: (G*Ho, G*Hin) f32 block-diagonal H-interp matrix
    rxT_ref:   (Win, Wo)     compute-dtype W-interp matrix (transposed)
    img_ref:   (G*Hin, Win)  compute-dtype input block
    out_ref:   (G*Ho, Wo)    f32 output block (== row-major (fpb, C, Ho, Wo))
    tmp_ref:   (G*Hin, Wo)   f32 scratch
    """

    def kernel(ry_bd_ref, rxT_ref, img_ref, out_ref, tmp_ref):
        # W-pass: ONE matmul for the whole block, full-row scratch store.
        tmp_ref[...] = jnp.dot(img_ref[...], rxT_ref[...],
                               preferred_element_type=jnp.float32)
        # H-pass: ONE matmul against the block-diagonal ry; dense store of the
        # full output block (last two dims equal the full array dims).
        out_ref[...] = jnp.dot(ry_bd_ref[...], tmp_ref[...],
                               preferred_element_type=jnp.float32)

    return kernel


def _make_head_post_kernel(w, b, sx, sy, thr_logit):
    """Fused surrogate head + post-processing.

    feat_ref: (F, M) f32, base_ref: (2, M) f32  ->  tr_ref: (2, M) f32,
    vis_ref: (1, M) int32.  Head params baked as immediates; the (M,F)@(F,3)
    product is done as unrolled VPU broadcast-FMAs (no MXU for a 5->3 map).
    sigmoid(z) > 0.9  <=>  z > log(0.9/0.1), so no EUP transcendental needed.
    """
    n_feat = len(w)

    def kernel(feat_ref, base_ref, tr_ref, vis_ref):
        f = feat_ref[...]
        outs = []
        for j in range(3):
            acc = b[j] + w[0][j] * f[0:1, :]
            for k in range(1, n_feat):
                acc = acc + w[k][j] * f[k:k + 1, :]
            outs.append(acc)
        tr_ref[0:1, :] = (base_ref[0:1, :] + outs[0]) * sx
        tr_ref[1:2, :] = (base_ref[1:2, :] + outs[1]) * sy
        vis_ref[...] = (outs[2] > thr_logit).astype(jnp.int32)

    return kernel


# ----------------------------------------------------------------------------
# Resize wrapper
# ----------------------------------------------------------------------------
def _interp_matrix_np(out_size, in_size):
    """1-D bilinear interpolation matrix (align_corners=True), built on host."""
    if out_size == 1:
        pos = np.zeros((1,), np.float64)
    else:
        pos = np.arange(out_size, dtype=np.float64) * (
            (in_size - 1) / max(out_size - 1, 1))
    i0 = np.clip(np.floor(pos), 0, in_size - 1).astype(np.int64)
    i1 = np.clip(i0 + 1, 0, in_size - 1)
    frac = (pos - i0).astype(np.float32)
    m = np.zeros((out_size, in_size), np.float32)
    rows = np.arange(out_size)
    m[rows, i0] += (1.0 - frac)
    m[rows, i1] += frac
    return m


def _block_diag_np(m, g):
    ho, hi = m.shape
    out = np.zeros((g * ho, g * hi), np.float32)
    for k in range(g):
        out[k * ho:(k + 1) * ho, k * hi:(k + 1) * hi] = m
    return out


def _pick_frames_per_block(bt, c, hin, win, ho, wo, elem_bytes,
                           vmem_cap, num_cores):
    """Pick the per-grid-step frame count.

    - multi-TC chips (v7x): keep >= 4 grid steps (>= 2 per core) so BlockSpec
      pipelining hides the input DMA on both cores;
    - single-TC chips (v5e/v6e): the grid is a serial loop, so take the
      largest block that fits the VMEM budget (fewest per-step overheads,
      biggest DMAs);
    - cap G to bound the block-diagonal ry (quadratic in G) and its MXU
      zero-block waste; the VMEM budget is the real limiter at HD sizes.
    """
    min_steps = 4 if (num_cores >= 2 and bt >= 4) else 1
    budget = int(0.45 * vmem_cap)
    best = 1
    for d in range(1, bt + 1):
        if bt % d:
            continue
        if bt // d < min_steps:
            continue
        g = d * c
        if g > 32:
            continue
        blk = (2 * g * hin * win * elem_bytes      # input block, double-buffered
               + 2 * g * ho * wo * 4               # f32 output block, dbl-buffered
               + g * hin * wo * 4                  # f32 W-pass scratch
               + 2 * (g * ho) * (g * hin) * 4      # block-diag ry (f32), dbl-buffered
               + 2 * win * wo * elem_bytes)        # rxT
        if blk > budget:
            continue
        best = d
    return best


def bilinear_resize_pallas(vid_bt, ry_bd, rxT, fpb,
                           compute_dtype=jnp.float32):
    """vid_bt: (BT, C, Hin, Win) -> (BT, C, Ho, Wo), bilinear align_corners=True.

    All reshapes around the pallas_call are free row-major reshapes (no
    transpose, no extra HBM pass)."""
    BT, C, Hin, Win = vid_bt.shape
    G = fpb * C
    assert BT % fpb == 0
    n_blocks = BT // fpb
    Ho = ry_bd.shape[0] // G
    assert ry_bd.shape == (G * Ho, G * Hin)
    Wo = rxT.shape[1]
    elem_bytes = np.dtype(compute_dtype).itemsize

    # Cast on the wrapper side so the HBM->VMEM DMA is already narrow for the
    # bf16 path (no-op for the default f32 path).
    x = vid_bt.astype(compute_dtype).reshape(n_blocks, G * Hin, Win)
    rxT_c = rxT.astype(compute_dtype)
    ry_bd_f32 = ry_bd.astype(jnp.float32)   # H-pass stays f32 (single rounding)

    vmem_cap, _ = _tpu_budget()
    need = (2 * G * Hin * Win * elem_bytes
            + 2 * G * Ho * Wo * 4
            + G * Hin * Wo * 4
            + 2 * ry_bd_f32.size * 4
            + 2 * rxT_c.size * elem_bytes)
    vmem_limit = int(min(max(need + (4 << 20), 16 << 20),
                         int(0.9 * vmem_cap)))
    vmem_limit = max(vmem_limit, int(need))

    out = pl.pallas_call(
        _make_resize_kernel(),
        out_shape=jax.ShapeDtypeStruct((n_blocks, G * Ho, Wo), jnp.float32),
        grid=(n_blocks,),
        in_specs=[
            pl.BlockSpec((G * Ho, G * Hin), lambda i: (0, 0)),   # constant block
            pl.BlockSpec((Win, Wo), lambda i: (0, 0)),           # constant block
            pl.BlockSpec((None, G * Hin, Win), lambda i: (i, 0, 0)),
        ],
        out_specs=pl.BlockSpec((None, G * Ho, Wo), lambda i: (i, 0, 0)),
        scratch_shapes=[pltpu.VMEM((G * Hin, Wo), jnp.float32)],
        compiler_params=pltpu.CompilerParams(
            dimension_semantics=("parallel",),
            vmem_limit_bytes=vmem_limit),
    )(ry_bd_f32, rxT_c, x)

    # (n_blocks, G*Ho, Wo) == (n_blocks, fpb, C, Ho, Wo) row-major — free.
    return out.reshape(BT, C, Ho, Wo)


# ----------------------------------------------------------------------------
# Plain-JAX glue (matches the PyTorch helpers)
# ----------------------------------------------------------------------------
def get_points_on_a_grid(size, extent):
    """extent = (H, W); returns (1, size*size, 2) of (x, y) points."""
    if size == 1:
        return jnp.array([[[extent[1] / 2.0, extent[0] / 2.0]]],
                         dtype=jnp.float32)
    center = (extent[0] / 2.0, extent[1] / 2.0)
    margin = extent[1] / 64.0
    range_y = (margin - extent[0] / 2.0 + center[0],
               extent[0] / 2.0 + center[0] - margin)
    range_x = (margin - extent[1] / 2.0 + center[1],
               extent[1] / 2.0 + center[1] - margin)
    ys = jnp.linspace(range_y[0], range_y[1], size)
    xs = jnp.linspace(range_x[0], range_x[1], size)
    gy, gx = jnp.meshgrid(ys, xs, indexing="ij")
    return jnp.stack([gx, gy], axis=-1).reshape(1, -1, 2).astype(jnp.float32)


def _point_weights(pos, size):
    """pos: (B, N) float coords -> (B, N, size) separable bilinear weights."""
    p = jnp.clip(pos, 0.0, size - 1.0)
    i0 = jnp.clip(jnp.floor(p), 0, size - 1).astype(jnp.int32)
    i1 = jnp.clip(i0 + 1, 0, size - 1)
    frac = p - i0.astype(p.dtype)
    cols = jnp.arange(size)
    return ((cols[None, None, :] == i0[..., None]).astype(p.dtype)
            * (1.0 - frac)[..., None]
            + (cols[None, None, :] == i1[..., None]).astype(p.dtype)
            * frac[..., None])


# ----------------------------------------------------------------------------
# Predictor
# ----------------------------------------------------------------------------
class CoTrackerOnlinePredictorPallas:
    def __init__(self, interp_shape=(24, 32), window_len=8,
                 compute_dtype=jnp.float32):
        self.support_grid_size = 6
        self.interp_shape = tuple(int(v) for v in interp_shape)
        self.step = window_len // 2
        self.queries = None
        # compute_dtype=jnp.bfloat16 halves the resize input DMA (cast happens
        # in the wrapper) and doubles MXU rate on v6e/v7x; weights/accumulation
        # stay f32.  Default keeps float32 for exact F.interpolate parity.
        self.compute_dtype = compute_dtype
        # Deterministic surrogate head ((C+2) -> (dx, dy, vis_logit)); baked
        # into the fused head kernel as immediates.
        rng = np.random.default_rng(1234)
        w = (0.1 * rng.standard_normal((3 + 2, 3))).astype(np.float32)
        self._head_w = [[float(v) for v in row] for row in w]
        self._head_b = [0.0, 0.0, 2.5]
        self._resize_cache = {}
        self._step_cache = {}

    # -- cached resources -----------------------------------------------
    def _resize_resources(self, BT, C, Hin, Win):
        key = (BT, C, Hin, Win, self.interp_shape,
               str(np.dtype(self.compute_dtype)))
        if key not in self._resize_cache:
            Ho, Wo = self.interp_shape
            vmem_cap, num_cores = _tpu_budget()
            elem_bytes = np.dtype(self.compute_dtype).itemsize
            fpb = _pick_frames_per_block(BT, C, Hin, Win, Ho, Wo,
                                         elem_bytes, vmem_cap, num_cores)
            ry = _interp_matrix_np(Ho, Hin)
            rxT = _interp_matrix_np(Wo, Win).T
            ry_bd = jnp.asarray(_block_diag_np(ry, fpb * C))
            self._resize_cache[key] = (fpb, ry_bd, jnp.asarray(rxT),
                                       jnp.asarray(ry))
        return self._resize_cache[key]

    def _step_fn(self, B, T, C, H, W):
        key = (B, T, C, H, W)
        if key in self._step_cache:
            return self._step_cache[key]

        Ho, Wo = self.interp_shape
        fpb, ry_bd, rxT, _ = self._resize_resources(B * T, C, H, W)
        sx = (W - 1) / max(Wo - 1, 1)
        sy = (H - 1) / max(Ho - 1, 1)
        thr_logit = math.log(0.9) - math.log(1.0 - 0.9)
        head_kernel = _make_head_post_kernel(self._head_w, self._head_b,
                                             sx, sy, thr_logit)
        compute_dtype = self.compute_dtype

        def step(video_chunk, queries):
            # --- F.interpolate(bilinear, align_corners=True) in Pallas ---
            vid = bilinear_resize_pallas(
                video_chunk.reshape(B * T, C, H, W), ry_bd, rxT, fpb,
                compute_dtype=compute_dtype)
            vid = vid.reshape(B, T, C, Ho, Wo)

            # --- surrogate CoTracker model (plain-JAX sampling glue) ---
            # TODO(synk): real CoTracker CNN/transformer not reproduced.
            N = queries.shape[1]
            M = B * T * N
            qx = queries[:, :, 1]
            qy = queries[:, :, 2]
            wy = _point_weights(qy, Ho)                      # (B, N, Ho)
            wx = _point_weights(qx, Wo)                      # (B, N, Wo)
            # Channel-first ordering: no (M, F).T transpose feeding the head.
            feat_rgb = jnp.einsum("bnh,btchw,bnw->cbtn", wy, vid, wx)
            qnorm = jnp.stack([qx / max(Wo - 1, 1), qy / max(Ho - 1, 1)], 0)
            qnorm = jnp.broadcast_to(qnorm[:, :, None, :], (2, B, T, N))
            feat_t = jnp.concatenate([feat_rgb, qnorm], axis=0)
            feat_t = feat_t.reshape(C + 2, M).astype(jnp.float32)    # (F, M)
            base = jnp.broadcast_to(jnp.stack([qx, qy], 0)[:, :, None, :],
                                    (2, B, T, N)).reshape(2, M)
            base = base.astype(jnp.float32)                          # (2, M)

            # --- fused head + unscale + visibility threshold in Pallas ---
            tr, vis = pl.pallas_call(
                head_kernel,
                out_shape=(jax.ShapeDtypeStruct((2, M), jnp.float32),
                           jax.ShapeDtypeStruct((1, M), jnp.int32)),
                in_specs=[
                    pl.BlockSpec(memory_space=pltpu.MemorySpace.VMEM),
                    pl.BlockSpec(memory_space=pltpu.MemorySpace.VMEM)],
                out_specs=(
                    pl.BlockSpec(memory_space=pltpu.MemorySpace.VMEM),
                    pl.BlockSpec(memory_space=pltpu.MemorySpace.VMEM)),
            )(feat_t, base)
            tracks = jnp.moveaxis(tr.reshape(2, B, T, N), 0, -1)
            visibilities = vis.reshape(B, T, N).astype(jnp.bool_)
            return tracks, visibilities

        fn = jax.jit(step)
        self._step_cache[key] = fn
        return fn

    # -- forward ----------------------------------------------------------
    def __call__(self, video_chunk, is_first_step=False, queries=None,
                 grid_size=10, grid_query_frame=0, add_support_grid=False):
        B, T, C, H, W = video_chunk.shape
        Ho, Wo = self.interp_shape

        if is_first_step:
            if queries is not None:
                assert queries.shape[-1] == 3
                # One-off (N, 3) rescale kept in plain JAX: a dedicated
                # pallas_call here is pure launch overhead.
                scale = jnp.array(
                    [1.0, (Wo - 1) / max(W - 1, 1), (Ho - 1) / max(H - 1, 1)],
                    jnp.float32)
                queries = queries.astype(jnp.float32) * scale
            elif grid_size > 0:
                grid_pts = get_points_on_a_grid(grid_size, self.interp_shape)
                queries = jnp.concatenate(
                    [jnp.full_like(grid_pts[:, :, :1],
                                   float(grid_query_frame)), grid_pts],
                    axis=2)
            if add_support_grid:
                grid_pts = get_points_on_a_grid(self.support_grid_size,
                                                self.interp_shape)
                grid_pts = jnp.concatenate(
                    [jnp.zeros_like(grid_pts[:, :, :1]), grid_pts], axis=2)
                grid_pts = jnp.broadcast_to(
                    grid_pts, (queries.shape[0],) + grid_pts.shape[1:])
                queries = jnp.concatenate([queries, grid_pts], axis=1)
            self.queries = queries
            return (None, None)

        if self.queries is None:
            raise ValueError("call with is_first_step=True before streaming")
        assert C == 3, "CoTracker expects RGB input"
        step_fn = self._step_fn(B, T, C, H, W)
        return step_fn(video_chunk, self.queries)


# ----------------------------------------------------------------------------
if __name__ == "__main__":
    key = jax.random.PRNGKey(0)
    B, T, C, H, W = 1, 8, 3, 20, 30
    interp_shape = (24, 32)
    N = 16

    k1, k2, k3 = jax.random.split(key, 3)
    video_chunk = jax.random.uniform(k1, (B, T, C, H, W), dtype=jnp.float32)
    qt = jnp.zeros((B, N, 1), jnp.float32)
    qx = jax.random.uniform(k2, (B, N, 1), minval=0.0, maxval=float(W - 1))
    qy = jax.random.uniform(k3, (B, N, 1), minval=0.0, maxval=float(H - 1))
    queries = jnp.concatenate([qt, qx, qy], axis=2)

    predictor = CoTrackerOnlinePredictorPallas(interp_shape=interp_shape,
                                               window_len=8)

    # Plumbing check: Pallas resize == plain-JAX separable resize.
    fpb, ry_bd, rxT, ry = predictor._resize_resources(B * T, C, H, W)
    got = bilinear_resize_pallas(video_chunk.reshape(B * T, C, H, W),
                                 ry_bd, rxT, fpb)
    ref = jnp.einsum("oh,bchw,wx->bcox", ry,
                     video_chunk.reshape(B * T, C, H, W), rxT)
    assert bool(jnp.allclose(got, ref, atol=1e-3)), "resize mismatch"

    # first step: register queries (returns (None, None) like the PyTorch module)
    first = predictor(video_chunk, is_first_step=True, queries=queries)
    assert first == (None, None)

    # subsequent step: full Pallas path
    tracks, visibilities = predictor(video_chunk, is_first_step=False)
    jax.block_until_ready((tracks, visibilities))

    assert tracks.shape == (B, T, N, 2) and tracks.dtype == jnp.float32
    assert visibilities.shape == (B, T, N) and visibilities.dtype == jnp.bool_
    print("KERNEL_OK")
</pallas_src>

<mosaic_0001>
module attributes {stable_mosaic.version = 11 : i64} {
  func.func @kernel(%arg0: i32, %arg1: memref<576x480xf32, #tpu.memory_space<vmem>>, %arg2: memref<30x32xf32, #tpu.memory_space<vmem>>, %arg3: memref<1x480x30xf32, #tpu.memory_space<vmem>>, %arg4: memref<1x576x32xf32, #tpu.memory_space<vmem>>, %arg5: memref<480x32xf32, #tpu.memory_space<vmem>>) attributes {dimension_semantics = [#tpu.dimension_semantics<parallel>], iteration_bounds = array<i64: 1>, scalar_prefetch = 0 : i64, scratch_operands = 1 : i64, tpu.core_type = #tpu.core_type<tc>, window_params = [{pipeline_mode = #tpu.pipeline_mode<synchronous>, transform_indices = @transform_0, window_bounds = array<i64: 576, 480>}, {pipeline_mode = #tpu.pipeline_mode<synchronous>, transform_indices = @transform_1, window_bounds = array<i64: 30, 32>}, {transform_indices = @transform_2, window_bounds = array<i64: 1, 480, 30>}, {transform_indices = @transform_3, window_bounds = array<i64: 1, 576, 32>}]} {
    %c0 = arith.constant 0 : index
    %c0_0 = arith.constant 0 : index
    %c0_1 = arith.constant 0 : index
    %0 = vector.load %arg3[%c0, %c0_0, %c0_1] : memref<1x480x30xf32, #tpu.memory_space<vmem>>, vector<1x480x30xf32>
    %1 = vector.shape_cast %0 : vector<1x480x30xf32> to vector<480x30xf32>
    %c0_2 = arith.constant 0 : index
    %c0_3 = arith.constant 0 : index
    %2 = vector.load %arg2[%c0_2, %c0_3] : memref<30x32xf32, #tpu.memory_space<vmem>>, vector<30x32xf32>
    %cst = arith.constant dense<0.000000e+00> : vector<480x32xf32>
    %3 = tpu.matmul %1, %2, %cst {dimension_numbers = #tpu.dot_dimension_numbers<[1], [0], [0], [1], [0, 0, 1, 1], [], []>} : vector<480x30xf32>, vector<30x32xf32>, vector<480x32xf32> -> vector<480x32xf32>
    %c0_4 = arith.constant 0 : index
    %c0_5 = arith.constant 0 : index
    %4 = vector.load %arg5[%c0_4, %c0_5] : memref<480x32xf32, #tpu.memory_space<vmem>>, vector<480x32xf32>
    tpu.vector_store %arg5[%c0_4, %c0_5], %3 {strides = array<i32>} : memref<480x32xf32, #tpu.memory_space<vmem>>, vector<480x32xf32>,
    %c0_6 = arith.constant 0 : index
    %c0_7 = arith.constant 0 : index
    %5 = vector.load %arg1[%c0_6, %c0_7] : memref<576x480xf32, #tpu.memory_space<vmem>>, vector<576x480xf32>
    %c0_8 = arith.constant 0 : index
    %c0_9 = arith.constant 0 : index
    %6 = vector.load %arg5[%c0_8, %c0_9] : memref<480x32xf32, #tpu.memory_space<vmem>>, vector<480x32xf32>
    %cst_10 = arith.constant dense<0.000000e+00> : vector<576x32xf32>
    %7 = tpu.matmul %5, %6, %cst_10 {dimension_numbers = #tpu.dot_dimension_numbers<[1], [0], [0], [1], [0, 0, 1, 1], [], []>} : vector<576x480xf32>, vector<480x32xf32>, vector<576x32xf32> -> vector<576x32xf32>
    %c0_11 = arith.constant 0 : index
    %c0_12 = arith.constant 0 : index
    %c0_13 = arith.constant 0 : index
    %8 = vector.load %arg4[%c0_11, %c0_12, %c0_13] : memref<1x576x32xf32, #tpu.memory_space<vmem>>, vector<1x576x32xf32>
    %9 = vector.shape_cast %8 : vector<1x576x32xf32> to vector<576x32xf32>
    %10 = vector.shape_cast %7 : vector<576x32xf32> to vector<1x576x32xf32>
    tpu.vector_store %arg4[%c0_11, %c0_12, %c0_13], %10 {strides = array<i32>} : memref<1x576x32xf32, #tpu.memory_space<vmem>>, vector<1x576x32xf32>,
    return
  }
  func.func @transform_0(%arg0: i32) -> (i32, i32) {
    %c0_i32 = arith.constant 0 : i32
    %c0_i32_0 = arith.constant 0 : i32
    %c0_i32_1 = arith.constant 0 : i32
    return %c0_i32, %c0_i32_0 : i32, i32
  }
  func.func @transform_1(%arg0: i32) -> (i32, i32) {
    %c0_i32 = arith.constant 0 : i32
    %c0_i32_0 = arith.constant 0 : i32
    %c0_i32_1 = arith.constant 0 : i32
    return %c0_i32, %c0_i32_0 : i32, i32
  }
  func.func @transform_2(%arg0: i32) -> (i32, i32, i32) {
    %c0_i32 = arith.constant 0 : i32
    %c0_i32_0 = arith.constant 0 : i32
    %c0_i32_1 = arith.constant 0 : i32
    return %arg0, %c0_i32, %c0_i32_0 : i32, i32, i32
  }
  func.func @transform_3(%arg0: i32) -> (i32, i32, i32) {
    %c0_i32 = arith.constant 0 : i32
    %c0_i32_0 = arith.constant 0 : i32
    %c0_i32_1 = arith.constant 0 : i32
    return %arg0, %c0_i32, %c0_i32_0 : i32, i32, i32
  }
}

</mosaic_0001>

<bundles_post_ra>
// kernel: tpu_custom_call.1
= control target key start
LH: loop header
LB: loop body
LE: loop exit
PB: predicated region body
PF: predicated region fallthrough
CT: control target
= control target key end

     0   :  { %8 = vsyncpa [#allocation4], 0  ;;  %s3317_s0 = inlined_call_operand.hbm [shape: f32[576,480], index: 0, kind: input, shape index: {}]   ;;  %s3318_s1 = inlined_call_operand.hbm [shape: f32[30,32], index: 1, kind: input, shape index: {}]   ;;  %s3319_s2 = inlined_call_operand.vmem [shape: f32[1,480,30], index: 2, kind: input, shape index: {}]   ;;  %s3320_s3 = inlined_call_operand.vmem [shape: f32[1,576,32], index: 3, kind: output, shape index: {}]  }
   0x1   :  { %9 = vsyncpa [#allocation6], 0  ;;  %s2564_s12 = smov [#allocation3]  }
   0x2   :  { %s15_s13 = sshll.u32 %s2564_s12, 4  ;;  %s16_s13 = int_to_ptr.vmem [resolvable:$true] %s15_s13 }
   0x3   :  { %s2528_s14 = scalar_lea.vmem %s16_s13, 36864  ;;  %p2533_p1 = scmp.lt.s32.totalorder %s16_s13, %s16_s13 }
   0x4   :  { %p2529_p0 = scmp.ne.s32.totalorder %s16_s13, %s2528_s14  ;;  %p2534_p2 = scmp.lt.s32.totalorder %s2528_s14, %s2528_s14 }
   0x6   :  { %p2535_p3 = por %p2534_p2, %p2533_p1 }
   0x8   :  { %p2536_p4 = pnand %p2535_p3, %p2529_p0 }
   0xa   :  { %2539 = shalt.err (!%p2536_p4)
}
   0xb   :  { %s2565_s15 = smov 512   ;;  %s2566_s16 = smov 32  }
   0xc   :  { %21 = dma.hbm_to_vmem [thread:$0]  %s3317_s0, 36864, %s16_s13, [#allocation4], %s2565_s15, %s2565_s15, %s2566_s16  }
   0xd   :  { %s2567_s19 = smov [#allocation5]  }
   0xe   :  { %s27_s20 = sshll.u32 %s2567_s19, 4  ;;  %s28_s20 = int_to_ptr.vmem [resolvable:$true] %s27_s20 }
   0xf   :  { %s2548_s21 = scalar_lea.vmem %s28_s20, 512  ;;  %p2553_p6 = scmp.lt.s32.totalorder %s28_s20, %s28_s20 }
  0x10   :  { %p2549_p5 = scmp.ne.s32.totalorder %s28_s20, %s2548_s21  ;;  %p2554_p7 = scmp.lt.s32.totalorder %s2548_s21, %s2548_s21 }
  0x12   :  { %p2555_p8 = por %p2554_p7, %p2553_p6 }
  0x14   :  { %p2556_p9 = pnand %p2555_p8, %p2549_p5 }
  0x16   :  { %2559 = shalt.err (!%p2556_p9)
}
  0x17   :  { %s2568_s22 = smov 128   ;;  %s2569_s23 = smov 8  }
  0x18   :  { %33 = dma.hbm_to_vmem [thread:$0]  %s3318_s1, 512, %s28_s20, [#allocation6], %s2568_s22, %s2568_s22, %s2569_s23  }
  0x19   :  { %2560 = dma.done.wait [#allocation4], 36864  }
  0x1a   :  { %2561 = vsyncadd [#allocation4], 4294930432 }
  0x1b   :  { %2562 = dma.done.wait [#allocation6], 512  }
  0x1c   :  { %2563 = vsyncadd [#allocation6], 4294966784  ;;  %vm287_vm0 = vcmask 1045504   ;;  %v105_v0 = vld [vmem:[#allocation5 + $0x18] sm:$0x3f]  ;;  %v104_v1 = vld [vmem:[#allocation5 + $0x10] sm:$0xff] }
  0x1d   :  { %2407 = vmatprep.subr.msk.mxu0 %vm287_vm0, %v105_v0  ;;  %2505 = vmatprep.subr.msk.mxu1 %vm287_vm0, %v105_v0  ;;  %v103_v2 = vld [vmem:[#allocation5 + $0x8] sm:$0xff]  ;;  %v102_v3 = vld [vmem:[#allocation5] sm:$0xff]  ;;  %vm106_vm1 = vcmask 244736   ;;  %v44_v8 = vld [vmem:[%s3319_s2 + $0x10] sm:$0xff]  ;;  %vm1065_vm2 = vcmask 785408   ;;  %vm656_vm3 = vcmask 261120  }
  0x1e   :  { %2408 = vmatpush3.msk.msra.mxu0 %vm287_vm0, %v105_v0  ;;  %2509 = vmatpush3.msk.msra.mxu1 %vm287_vm0, %v105_v0  ;;  %v42_v4 = vld [vmem:[%s3319_s2] sm:$0xff]  ;;  %v43_v6 = vld [vmem:[%s3319_s2 + $0x8] sm:$0xff]  ;;  %v72_v9 = vld [vmem:[%s3319_s2 + $0xf0] sm:$0xff]  ;;  %v2570_v0 = vmov 0.0  }
  0x1f   :  { %2409 = vmatprep.subr.mxu0 %v104_v1  ;;  %2506 = vmatprep.subr.mxu1 %v104_v1  ;;  %v70_v5 = vld [vmem:[%s3319_s2 + $0xe0] sm:$0xff]  ;;  %v71_v7 = vld [vmem:[%s3319_s2 + $0xe8] sm:$0xff]  ;;  %v45_v10 = vld [vmem:[%s3319_s2 + $0x18] sm:$0xff] }
  0x20   :  { %2410 = vmatpush3.msra.mxu0 %v104_v1  ;;  %2510 = vmatpush3.msra.mxu1 %v104_v1  ;;  %v73_v11 = vld [vmem:[%s3319_s2 + $0xf8] sm:$0xff]  ;;  %v46_v12 = vld [vmem:[%s3319_s2 + $0x20] sm:$0xff]  ;;  %v47_v14 = vld [vmem:[%s3319_s2 + $0x28] sm:$0xff] }
  0x21   :  { %2411 = vmatprep.subr.mxu0 %v103_v2  ;;  %2507 = vmatprep.subr.mxu1 %v103_v2  ;;  %v74_v13 = vld [vmem:[%s3319_s2 + $0x100] sm:$0xff]  ;;  %v75_v15 = vld [vmem:[%s3319_s2 + $0x108] sm:$0xff]  ;;  %v48_v16 = vld [vmem:[%s3319_s2 + $0x30] sm:$0xff] }
  0x22   :  { %2412 = vmatpush3.msra.mxu0 %v103_v2  ;;  %2511 = vmatpush3.msra.mxu1 %v103_v2  ;;  %v76_v17 = vld [vmem:[%s3319_s2 + $0x110] sm:$0xff]  ;;  %v49_v18 = vld [vmem:[%s3319_s2 + $0x38] sm:$0xff]  ;;  %v50_v20 = vld [vmem:[%s3319_s2 + $0x40] sm:$0xff] }
  0x23   :  { %2413 = vmatprep.subr.mxu0 %v102_v3  ;;  %2508 = vmatprep.subr.mxu1 %v102_v3  ;;  %v77_v19 = vld [vmem:[%s3319_s2 + $0x118] sm:$0xff]  ;;  %v78_v21 = vld [vmem:[%s3319_s2 + $0x120] sm:$0xff]  ;;  %v51_v22 = vld [vmem:[%s3319_s2 + $0x48] sm:$0xff] }
  0x24   :  { %2414 = vmatpush3.msra.mxu0 %v102_v3  ;;  %2512 = vmatpush3.msra.mxu1 %v102_v3  ;;  %v79_v23 = vld [vmem:[%s3319_s2 + $0x128] sm:$0xff]  ;;  %v52_v24 = vld [vmem:[%s3319_s2 + $0x50] sm:$0xff]  ;;  %v53_v26 = vld [vmem:[%s3319_s2 + $0x58] sm:$0xff] }
  0x25   :  { %2415 = vmatprep.mubr.msk.f32.mxu0 %vm106_vm1, %v42_v4  ;;  %2457 = vmatprep.mubr.msk.f32.mxu1 %vm106_vm1, %v70_v5  ;;  %v80_v25 = vld [vmem:[%s3319_s2 + $0x130] sm:$0xff]  ;;  %v81_v27 = vld [vmem:[%s3319_s2 + $0x138] sm:$0xff]  ;;  %v54_v28 = vld [vmem:[%s3319_s2 + $0x60] sm:$0xff] }
  0x26   :  { %2416 = vmatmul.mubr.msk.f32.vlgmr.msra.gmra.mxu0 %vm106_vm1, %v43_v6  ;;  %2458 = vmatmul.mubr.msk.f32.vlgmr.msra.gmra.mxu1 %vm106_vm1, %v71_v7  ;;  %v82_v29 = vld [vmem:[%s3319_s2 + $0x140] sm:$0xff]  ;;  %v55_v30 = vld [vmem:[%s3319_s2 + $0x68] sm:$0xff]  ;;  %v56_v32 = vld [vmem:[%s3319_s2 + $0x70] sm:$0xff] }
  0x27   :  { %2418 = vmatprep.mubr.msk.f32.mxu0 %vm106_vm1, %v44_v8  ;;  %2460 = vmatprep.mubr.msk.f32.mxu1 %vm106_vm1, %v72_v9  ;;  %v83_v31 = vld [vmem:[%s3319_s2 + $0x148] sm:$0xff]  ;;  %v84_v33 = vld [vmem:[%s3319_s2 + $0x150] sm:$0xff]  ;;  %v57_v34 = vld [vmem:[%s3319_s2 + $0x78] sm:$0xff] }
  0x28   :  { %v85_v35 = vld [vmem:[%s3319_s2 + $0x158] sm:$0xff]  ;;  %v86_v36 = vld [vmem:[%s3319_s2 + $0x160] sm:$0xff]  ;;  %v87_v38 = vld [vmem:[%s3319_s2 + $0x168] sm:$0xff]  ;;  %1282 = vmatprep.subr.mxu1 %v2570_v0  ;;  %1707 = vmatprep.subr.mxu0 %v2570_v0 }
  0x29   :  { %v58_v37 = vld [vmem:[%s3319_s2 + $0x80] sm:$0xff]  ;;  %v59_v39 = vld [vmem:[%s3319_s2 + $0x88] sm:$0xff]  ;;  %v88_v40 = vld [vmem:[%s3319_s2 + $0x170] sm:$0xff] }
  0x2a   :  { %2419 = vmatmul.mubr.msk.f32.gmra.mxu0 %vm106_vm1, %v45_v10  ;;  %2461 = vmatmul.mubr.msk.f32.gmra.mxu1 %vm106_vm1, %v73_v11  ;;  %v60_v41 = vld [vmem:[%s3319_s2 + $0x90] sm:$0xff]  ;;  %v89_v42 = vld [vmem:[%s3319_s2 + $0x178] sm:$0xff]  ;;  %v90_v44 = vld [vmem:[%s3319_s2 + $0x180] sm:$0xff] }
  0x2b   :  { %2421 = vmatprep.mubr.msk.f32.mxu0 %vm106_vm1, %v46_v12  ;;  %2463 = vmatprep.mubr.msk.f32.mxu1 %vm106_vm1, %v74_v13  ;;  %v61_v43 = vld [vmem:[%s3319_s2 + $0x98] sm:$0xff]  ;;  %v62_v45 = vld [vmem:[%s3319_s2 + $0xa0] sm:$0xff]  ;;  %v91_v46 = vld [vmem:[%s3319_s2 + $0x188] sm:$0xff] }
  0x2c   :  { %v63_v47 = vld [vmem:[%s3319_s2 + $0xa8] sm:$0xff]  ;;  %v92_v48 = vld [vmem:[%s3319_s2 + $0x190] sm:$0xff]  ;;  %v93_v50 = vld [vmem:[%s3319_s2 + $0x198] sm:$0xff] }
  0x2d   :  { %v64_v49 = vld [vmem:[%s3319_s2 + $0xb0] sm:$0xff]  ;;  %v65_v51 = vld [vmem:[%s3319_s2 + $0xb8] sm:$0xff]  ;;  %v94_v52 = vld [vmem:[%s3319_s2 + $0x1a0] sm:$0xff] }
  0x2e   :  { %2422 = vmatmul.mubr.msk.f32.gmra.mxu0 %vm106_vm1, %v47_v14  ;;  %2464 = vmatmul.mubr.msk.f32.gmra.mxu1 %vm106_vm1, %v75_v15  ;;  %v66_v53 = vld [vmem:[%s3319_s2 + $0xc0] sm:$0xff]  ;;  %v95_v54 = vld [vmem:[%s3319_s2 + $0x1a8] sm:$0xff]  ;;  %v96_v56 = vld [vmem:[%s3319_s2 + $0x1b0] sm:$0xff] }
  0x2f   :  { %2424 = vmatprep.mubr.msk.f32.mxu0 %vm106_vm1, %v48_v16  ;;  %2466 = vmatprep.mubr.msk.f32.mxu1 %vm106_vm1, %v76_v17  ;;  %v67_v55 = vld [vmem:[%s3319_s2 + $0xc8] sm:$0xff]  ;;  %v68_v57 = vld [vmem:[%s3319_s2 + $0xd0] sm:$0xff]  ;;  %v97_v58 = vld [vmem:[%s3319_s2 + $0x1b8] sm:$0xff] }
  0x30   :  { %v69_v59 = vld [vmem:[%s3319_s2 + $0xd8] sm:$0xff]  ;;  %v98_v60 = vld [vmem:[%s3319_s2 + $0x1c0] sm:$0xff]  ;;  %v99_v61 = vld [vmem:[%s3319_s2 + $0x1c8] sm:$0xff] }
  0x31   :  { %v100_v62 = vld [vmem:[%s3319_s2 + $0x1d0] sm:$0xff]  ;;  %v101_v63 = vld [vmem:[%s3319_s2 + $0x1d8] sm:$0xff]  ;;  %v718_v1 = vld [vmem:[#allocation3 + $0x8] sm:$0xff] }
  0x32   :  { %2425 = vmatmul.mubr.msk.f32.gmra.mxu0 %vm106_vm1, %v49_v18  ;;  %2467 = vmatmul.mubr.msk.f32.gmra.mxu1 %vm106_vm1, %v77_v19  ;;  %v720_v2 = vld [vmem:[#allocation3 + $0x18] sm:$0xff] }
  0x33   :  { %2427 = vmatprep.mubr.msk.f32.mxu0 %vm106_vm1, %v50_v20  ;;  %2469 = vmatprep.mubr.msk.f32.mxu1 %vm106_vm1, %v78_v21 }
  0x36   :  { %2428 = vmatmul.mubr.msk.f32.gmra.mxu0 %vm106_vm1, %v51_v22  ;;  %2470 = vmatmul.mubr.msk.f32.gmra.mxu1 %vm106_vm1, %v79_v23 }
  0x37   :  { %2430 = vmatprep.mubr.msk.f32.mxu0 %vm106_vm1, %v52_v24  ;;  %2472 = vmatprep.mubr.msk.f32.mxu1 %vm106_vm1, %v80_v25 }
  0x3a   :  { %2431 = vmatmul.mubr.msk.f32.gmra.mxu0 %vm106_vm1, %v53_v26  ;;  %2473 = vmatmul.mubr.msk.f32.gmra.mxu1 %vm106_vm1, %v81_v27 }
  0x3b   :  { %2433 = vmatprep.mubr.msk.f32.mxu0 %vm106_vm1, %v54_v28  ;;  %2475 = vmatprep.mubr.msk.f32.mxu1 %vm106_vm1, %v82_v29 }
  0x3e   :  { %2434 = vmatmul.mubr.msk.f32.gmra.mxu0 %vm106_vm1, %v55_v30  ;;  %2476 = vmatmul.mubr.msk.f32.gmra.mxu1 %vm106_vm1, %v83_v31 }
  0x3f   :  { %2436 = vmatprep.mubr.msk.f32.mxu0 %vm106_vm1, %v56_v32  ;;  %2478 = vmatprep.mubr.msk.f32.mxu1 %vm106_vm1, %v84_v33 }
  0x42   :  { %2437 = vmatmul.mubr.msk.f32.gmra.mxu0 %vm106_vm1, %v57_v34  ;;  %2479 = vmatmul.mubr.msk.f32.gmra.mxu1 %vm106_vm1, %v85_v35 }
  0x43   :  { %2481 = vmatprep.mubr.msk.f32.mxu1 %vm106_vm1, %v86_v36  ;;  %2439 = vmatprep.mubr.msk.f32.mxu0 %vm106_vm1, %v58_v37 }
  0x46   :  { %2482 = vmatmul.mubr.msk.f32.gmra.mxu1 %vm106_vm1, %v87_v38  ;;  %2440 = vmatmul.mubr.msk.f32.gmra.mxu0 %vm106_vm1, %v59_v39 }
  0x47   :  { %2484 = vmatprep.mubr.msk.f32.mxu1 %vm106_vm1, %v88_v40  ;;  %2442 = vmatprep.mubr.msk.f32.mxu0 %vm106_vm1, %v60_v41 }
  0x4a   :  { %2485 = vmatmul.mubr.msk.f32.gmra.mxu1 %vm106_vm1, %v89_v42  ;;  %2443 = vmatmul.mubr.msk.f32.gmra.mxu0 %vm106_vm1, %v61_v43 }
  0x4b   :  { %2487 = vmatprep.mubr.msk.f32.mxu1 %vm106_vm1, %v90_v44  ;;  %2445 = vmatprep.mubr.msk.f32.mxu0 %vm106_vm1, %v62_v45 }
  0x4e   :  { %2488 = vmatmul.mubr.msk.f32.gmra.mxu1 %vm106_vm1, %v91_v46  ;;  %2446 = vmatmul.mubr.msk.f32.gmra.mxu0 %vm106_vm1, %v63_v47 }
  0x4f   :  { %2490 = vmatprep.mubr.msk.f32.mxu1 %vm106_vm1, %v92_v48  ;;  %2448 = vmatprep.mubr.msk.f32.mxu0 %vm106_vm1, %v64_v49 }
  0x52   :  { %2491 = vmatmul.mubr.msk.f32.gmra.mxu1 %vm106_vm1, %v93_v50  ;;  %2449 = vmatmul.mubr.msk.f32.gmra.mxu0 %vm106_vm1, %v65_v51 }
  0x53   :  { %2493 = vmatprep.mubr.msk.f32.mxu1 %vm106_vm1, %v94_v52  ;;  %2451 = vmatprep.mubr.msk.f32.mxu0 %vm106_vm1, %v66_v53 }
  0x56   :  { %2494 = vmatmul.mubr.msk.f32.gmra.mxu1 %vm106_vm1, %v95_v54  ;;  %2452 = vmatmul.mubr.msk.f32.gmra.mxu0 %vm106_vm1, %v67_v55 }
  0x57   :  { %2496 = vmatprep.mubr.msk.f32.mxu1 %vm106_vm1, %v96_v56  ;;  %2454 = vmatprep.mubr.msk.f32.mxu0 %vm106_vm1, %v68_v57 }
  0x5a   :  { %2497 = vmatmul.mubr.msk.f32.gmra.mxu1 %vm106_vm1, %v97_v58  ;;  %2455 = vmatmul.mubr.msk.f32.gmra.mxu0 %vm106_vm1, %v69_v59 }
  0x5b   :  { %2499 = vmatprep.mubr.msk.f32.mxu1 %vm106_vm1, %v98_v60  ;;  %2271 = vmatprep.mubr.msk.f32.mxu0 %vm1065_vm2, %v720_v2 }
  0x5e   :  { %2500 = vmatmul.mubr.msk.f32.gmra.mxu1 %vm106_vm1, %v99_v61 }
  0x5f   :  { %2502 = vmatprep.mubr.msk.f32.mxu1 %vm106_vm1, %v100_v62 }
  0x62   :  { %2503 = vmatmul.mubr.msk.f32.gmra.mxu1 %vm106_vm1, %v101_v63 }
  0x63   :  { %1346 = vmatprep.mubr.f32.mxu1 %v718_v1 }
  0xe6   :  { %v2417_v3 = vpop.f32.mrf.mxu0  ;;  %v2459_v4 = vpop.f32.mrf.mxu1 }
  0xe7   :  { %658 = vst.msk [vmem:[#allocation2 + $0x8] sm:$0xff] %vm656_vm3, %v2417_v3  ;;  %686 = vst.msk [vmem:[#allocation2 + $0xe8] sm:$0xff] %vm656_vm3, %v2459_v4 }
  0xe8   :  { %v357_v5 = vpop.f32.mrf.mxu0  ;;  %v497_v6 = vpop.f32.mrf.mxu1 }
  0xe9   :  { %657 = vst.msk [vmem:[#allocation2] sm:$0xff] %vm656_vm3, %v357_v5  ;;  %685 = vst.msk [vmem:[#allocation2 + $0xe0] sm:$0xff] %vm656_vm3, %v497_v6 }
  0xea   :  { %v2420_v7 = vpop.f32.mrf.mxu0  ;;  %v2462_v8 = vpop.f32.mrf.mxu1 }
  0xeb   :  { %660 = vst.msk [vmem:[#allocation2 + $0x18] sm:$0xff] %vm656_vm3, %v2420_v7  ;;  %688 = vst.msk [vmem:[#allocation2 + $0xf8] sm:$0xff] %vm656_vm3, %v2462_v8 }
  0xec   :  { %v367_v9 = vpop.f32.mrf.mxu0  ;;  %v507_v10 = vpop.f32.mrf.mxu1 }
  0xed   :  { %659 = vst.msk [vmem:[#allocation2 + $0x10] sm:$0xff] %vm656_vm3, %v367_v9  ;;  %687 = vst.msk [vmem:[#allocation2 + $0xf0] sm:$0xff] %vm656_vm3, %v507_v10 }
  0xee   :  { %v2423_v11 = vpop.f32.mrf.mxu0  ;;  %v2465_v12 = vpop.f32.mrf.mxu1 }
  0xef   :  { %662 = vst.msk [vmem:[#allocation2 + $0x28] sm:$0xff] %vm656_vm3, %v2423_v11  ;;  %690 = vst.msk [vmem:[#allocation2 + $0x108] sm:$0xff] %vm656_vm3, %v2465_v12 }
  0xf0   :  { %v377_v13 = vpop.f32.mrf.mxu0  ;;  %v517_v14 = vpop.f32.mrf.mxu1 }
  0xf1   :  { %661 = vst.msk [vmem:[#allocation2 + $0x20] sm:$0xff] %vm656_vm3, %v377_v13  ;;  %689 = vst.msk [vmem:[#allocation2 + $0x100] sm:$0xff] %vm656_vm3, %v517_v14 }
  0xf2   :  { %v2426_v15 = vpop.f32.mrf.mxu0  ;;  %v2468_v16 = vpop.f32.mrf.mxu1 }
  0xf3   :  { %664 = vst.msk [vmem:[#allocation2 + $0x38] sm:$0xff] %vm656_vm3, %v2426_v15  ;;  %692 = vst.msk [vmem:[#allocation2 + $0x118] sm:$0xff] %vm656_vm3, %v2468_v16 }
  0xf4   :  { %v387_v17 = vpop.f32.mrf.mxu0  ;;  %v527_v18 = vpop.f32.mrf.mxu1 }
  0xf5   :  { %663 = vst.msk [vmem:[#allocation2 + $0x30] sm:$0xff] %vm656_vm3, %v387_v17  ;;  %691 = vst.msk [vmem:[#allocation2 + $0x110] sm:$0xff] %vm656_vm3, %v527_v18  ;;  %v1008_v18 = vld [vmem:[#allocation2 + $0x18] sm:$0xff] }
  0xf6   :  { %v2429_v19 = vpop.f32.mrf.mxu0  ;;  %v2471_v20 = vpop.f32.mrf.mxu1  ;;  %v1010_v12 = vld [vmem:[#allocation2 + $0x28] sm:$0xff] }
  0xf7   :  { %666 = vst.msk [vmem:[#allocation2 + $0x48] sm:$0xff] %vm656_vm3, %v2429_v19  ;;  %694 = vst.msk [vmem:[#allocation2 + $0x128] sm:$0xff] %vm656_vm3, %v2471_v20 }
  0xf8   :  { %v397_v21 = vpop.f32.mrf.mxu0  ;;  %v537_v22 = vpop.f32.mrf.mxu1  ;;  %v1009_v15 = vld [vmem:[#allocation2 + $0x20] sm:$0xff] }
  0xf9   :  { %665 = vst.msk [vmem:[#allocation2 + $0x40] sm:$0xff] %vm656_vm3, %v397_v21  ;;  %693 = vst.msk [vmem:[#allocation2 + $0x120] sm:$0xff] %vm656_vm3, %v537_v22  ;;  %v1007_v21 = vld [vmem:[#allocation2 + $0x10] sm:$0xff] }
  0xfa   :  { %v2432_v23 = vpop.f32.mrf.mxu0  ;;  %v2474_v24 = vpop.f32.mrf.mxu1  ;;  %v1012_v4 = vld [vmem:[#allocation2 + $0x38] sm:$0xff] }
  0xfb   :  { %668 = vst.msk [vmem:[#allocation2 + $0x58] sm:$0xff] %vm656_vm3, %v2432_v23  ;;  %696 = vst.msk [vmem:[#allocation2 + $0x138] sm:$0xff] %vm656_vm3, %v2474_v24  ;;  %v1006_v24 = vld [vmem:[#allocation2 + $0x8] sm:$0xff] }
  0xfc   :  { %v407_v25 = vpop.f32.mrf.mxu0  ;;  %v547_v26 = vpop.f32.mrf.mxu1  ;;  %v1011_v8 = vld [vmem:[#allocation2 + $0x30] sm:$0xff] }
  0xfd   :  { %667 = vst.msk [vmem:[#allocation2 + $0x50] sm:$0xff] %vm656_vm3, %v407_v25  ;;  %695 = vst.msk [vmem:[#allocation2 + $0x130] sm:$0xff] %vm656_vm3, %v547_v26  ;;  %v1005_v26 = vld [vmem:[#allocation2] sm:$0xff] }
  0xfe   :  { %v2435_v27 = vpop.f32.mrf.mxu0  ;;  %v2477_v28 = vpop.f32.mrf.mxu1  ;;  %v1014_v59 = vld [vmem:[#allocation2 + $0x48] sm:$0xff] }
  0xff   :  { %670 = vst.msk [vmem:[#allocation2 + $0x68] sm:$0xff] %vm656_vm3, %v2435_v27  ;;  %698 = vst.msk [vmem:[#allocation2 + $0x148] sm:$0xff] %vm656_vm3, %v2477_v28  ;;  %v1042_v25 = vld [vmem:[#allocation2 + $0x128] sm:$0xff]  ;;  %v1036_v28 = vld [vmem:[#allocation2 + $0xf8] sm:$0xff] }
 0x100   :  { %v417_v29 = vpop.f32.mrf.mxu0  ;;  %v557_v30 = vpop.f32.mrf.mxu1  ;;  %v1013_v63 = vld [vmem:[#allocation2 + $0x40] sm:$0xff] }
 0x101   :  { %669 = vst.msk [vmem:[#allocation2 + $0x60] sm:$0xff] %vm656_vm3, %v417_v29  ;;  %697 = vst.msk [vmem:[#allocation2 + $0x140] sm:$0xff] %vm656_vm3, %v557_v30  ;;  %v1041_v27 = vld [vmem:[#allocation2 + $0x120] sm:$0xff]  ;;  %v1040_v29 = vld [vmem:[#allocation2 + $0x118] sm:$0xff] }
 0x102   :  { %v2438_v31 = vpop.f32.mrf.mxu0  ;;  %v2480_v32 = vpop.f32.mrf.mxu1  ;;  %v1016_v51 = vld [vmem:[#allocation2 + $0x58] sm:$0xff]  ;;  %v1035_v30 = vld [vmem:[#allocation2 + $0xf0] sm:$0xff] }
 0x103   :  { %672 = vst.msk [vmem:[#allocation2 + $0x78] sm:$0xff] %vm656_vm3, %v2438_v31  ;;  %700 = vst.msk [vmem:[#allocation2 + $0x158] sm:$0xff] %vm656_vm3, %v2480_v32  ;;  %v1044_v19 = vld [vmem:[#allocation2 + $0x138] sm:$0xff]  ;;  %v1039_v31 = vld [vmem:[#allocation2 + $0x110] sm:$0xff] }
 0x104   :  { %v427_v33 = vpop.f32.mrf.mxu0  ;;  %v567_v34 = vpop.f32.mrf.mxu1  ;;  %v1015_v55 = vld [vmem:[#allocation2 + $0x50] sm:$0xff]  ;;  %v1034_v32 = vld [vmem:[#allocation2 + $0xe8] sm:$0xff] }
 0x105   :  { %671 = vst.msk [vmem:[#allocation2 + $0x70] sm:$0xff] %vm656_vm3, %v427_v33  ;;  %699 = vst.msk [vmem:[#allocation2 + $0x150] sm:$0xff] %vm656_vm3, %v567_v34  ;;  %v1043_v22 = vld [vmem:[#allocation2 + $0x130] sm:$0xff]  ;;  %v1038_v33 = vld [vmem:[#allocation2 + $0x108] sm:$0xff] }
 0x106   :  { %v2483_v35 = vpop.f32.mrf.mxu1  ;;  %v2441_v36 = vpop.f32.mrf.mxu0  ;;  %v1018_v45 = vld [vmem:[#allocation2 + $0x68] sm:$0xff]  ;;  %v1033_v34 = vld [vmem:[#allocation2 + $0xe0] sm:$0xff] }
 0x107   :  { %702 = vst.msk [vmem:[#allocation2 + $0x168] sm:$0xff] %vm656_vm3, %v2483_v35  ;;  %674 = vst.msk [vmem:[#allocation2 + $0x88] sm:$0xff] %vm656_vm3, %v2441_v36  ;;  %v1046_v13 = vld [vmem:[#allocation2 + $0x148] sm:$0xff]  ;;  %v1037_v35 = vld [vmem:[#allocation2 + $0x100] sm:$0xff] }
 0x108   :  { %v577_v37 = vpop.f32.mrf.mxu1  ;;  %v437_v38 = vpop.f32.mrf.mxu0  ;;  %v1017_v48 = vld [vmem:[#allocation2 + $0x60] sm:$0xff] }
 0x109   :  { %701 = vst.msk [vmem:[#allocation2 + $0x160] sm:$0xff] %vm656_vm3, %v577_v37  ;;  %673 = vst.msk [vmem:[#allocation2 + $0x80] sm:$0xff] %vm656_vm3, %v437_v38  ;;  %v1045_v16 = vld [vmem:[#allocation2 + $0x140] sm:$0xff] }
 0x10a   :  { %v2486_v39 = vpop.f32.mrf.mxu1  ;;  %v1020_v40 = vld [vmem:[#allocation2 + $0x78] sm:$0xff]  ;;  %v2444_v41 = vpop.f32.mrf.mxu0 }
 0x10b   :  { %704 = vst.msk [vmem:[#allocation2 + $0x178] sm:$0xff] %vm656_vm3, %v2486_v39  ;;  %1283 = vmatpush1.msra.mxu1 %v1020_v40  ;;  %676 = vst.msk [vmem:[#allocation2 + $0x98] sm:$0xff] %vm656_vm3, %v2444_v41  ;;  %v1048_v5 = vld [vmem:[#allocation2 + $0x158] sm:$0xff] }
 0x10c   :  { %v587_v42 = vpop.f32.mrf.mxu1  ;;  %1284 = vmatprep.subr.mxu1 %v2570_v0  ;;  %v1019_v43 = vld [vmem:[#allocation2 + $0x70] sm:$0xff]  ;;  %v447_v44 = vpop.f32.mrf.mxu0 }
 0x10d   :  { %703 = vst.msk [vmem:[#allocation2 + $0x170] sm:$0xff] %vm656_vm3, %v587_v42  ;;  %1285 = vmatpush1.msra.mxu1 %v1019_v43  ;;  %675 = vst.msk [vmem:[#allocation2 + $0x90] sm:$0xff] %vm656_vm3, %v447_v44  ;;  %v1047_v9 = vld [vmem:[#allocation2 + $0x150] sm:$0xff] }
 0x10e   :  { %1286 = vmatprep.subr.mxu1 %v2570_v0  ;;  %v2489_v46 = vpop.f32.mrf.mxu1  ;;  %v2447_v47 = vpop.f32.mrf.mxu0  ;;  %v1050_v60 = vld [vmem:[#allocation2 + $0x168] sm:$0xff] }
 0x10f   :  { %1287 = vmatpush1.msra.mxu1 %v1018_v45  ;;  %706 = vst.msk [vmem:[#allocation2 + $0x188] sm:$0xff] %vm656_vm3, %v2489_v46  ;;  %678 = vst.msk [vmem:[#allocation2 + $0xa8] sm:$0xff] %vm656_vm3, %v2447_v47 }
 0x110   :  { %1288 = vmatprep.subr.mxu1 %v2570_v0  ;;  %v597_v49 = vpop.f32.mrf.mxu1  ;;  %v457_v50 = vpop.f32.mrf.mxu0  ;;  %v1049_v1 = vld [vmem:[#allocation2 + $0x160] sm:$0xff] }
 0x111   :  { %1289 = vmatpush1.msra.mxu1 %v1017_v48  ;;  %705 = vst.msk [vmem:[#allocation2 + $0x180] sm:$0xff] %vm656_vm3, %v597_v49  ;;  %677 = vst.msk [vmem:[#allocation2 + $0xa0] sm:$0xff] %vm656_vm3, %v457_v50 }
 0x112   :  { %1290 = vmatprep.subr.mxu1 %v2570_v0  ;;  %v1052_v52 = vld [vmem:[#allocation2 + $0x178] sm:$0xff]  ;;  %v2492_v53 = vpop.f32.mrf.mxu1  ;;  %v2450_v54 = vpop.f32.mrf.mxu0 }
 0x113   :  { %1291 = vmatpush1.msra.mxu1 %v1016_v51  ;;  %1708 = vmatpush1.msra.mxu0 %v1052_v52  ;;  %708 = vst.msk [vmem:[#allocation2 + $0x198] sm:$0xff] %vm656_vm3, %v2492_v53  ;;  %680 = vst.msk [vmem:[#allocation2 + $0xb8] sm:$0xff] %vm656_vm3, %v2450_v54  ;;  %v1024_v52 = vld [vmem:[#allocation2 + $0x98] sm:$0xff] }
 0x114   :  { %1292 = vmatprep.subr.mxu1 %v2570_v0  ;;  %1709 = vmatprep.subr.mxu0 %v2570_v0  ;;  %v1051_v56 = vld [vmem:[#allocation2 + $0x170] sm:$0xff]  ;;  %v607_v57 = vpop.f32.mrf.mxu1  ;;  %v467_v58 = vpop.f32.mrf.mxu0 }
 0x115   :  { %1293 = vmatpush1.msra.mxu1 %v1015_v55  ;;  %1710 = vmatpush1.msra.mxu0 %v1051_v56  ;;  %707 = vst.msk [vmem:[#allocation2 + $0x190] sm:$0xff] %vm656_vm3, %v607_v57  ;;  %679 = vst.msk [vmem:[#allocation2 + $0xb0] sm:$0xff] %vm656_vm3, %v467_v58  ;;  %v1023_v54 = vld [vmem:[#allocation2 + $0x90] sm:$0xff]  ;;  %v1022_v56 = vld [vmem:[#allocation2 + $0x88] sm:$0xff] }
 0x116   :  { %1294 = vmatprep.subr.mxu1 %v2570_v0  ;;  %1711 = vmatprep.subr.mxu0 %v2570_v0  ;;  %v2495_v61 = vpop.f32.mrf.mxu1  ;;  %v2453_v62 = vpop.f32.mrf.mxu0  ;;  %v1026_v48 = vld [vmem:[#allocation2 + $0xa8] sm:$0xff]  ;;  %v717_v58 = vld [vmem:[#allocation3] sm:$0xff] }
 0x117   :  { %1295 = vmatpush1.msra.mxu1 %v1014_v59  ;;  %1712 = vmatpush1.msra.mxu0 %v1050_v60  ;;  %710 = vst.msk [vmem:[#allocation2 + $0x1a8] sm:$0xff] %vm656_vm3, %v2495_v61  ;;  %682 = vst.msk [vmem:[#allocation2 + $0xc8] sm:$0xff] %vm656_vm3, %v2453_v62  ;;  %v1054_v57 = vld [vmem:[#allocation2 + $0x188] sm:$0xff]  ;;  %v719_v59 = vld [vmem:[#allocation3 + $0x10] sm:$0xff] }
 0x118   :  { %1296 = vmatprep.subr.mxu1 %v2570_v0  ;;  %1713 = vmatprep.subr.mxu0 %v2570_v0  ;;  %v617_v2 = vpop.f32.mrf.mxu1  ;;  %v477_v3 = vpop.f32.mrf.mxu0  ;;  %v1025_v50 = vld [vmem:[#allocation2 + $0xa0] sm:$0xff]  ;;  %v722_v60 = vld [vmem:[#allocation3 + $0x28] sm:$0xff] }
 0x119   :  { %1297 = vmatpush1.msra.mxu1 %v1013_v63  ;;  %1714 = vmatpush1.msra.mxu0 %v1049_v1  ;;  %709 = vst.msk [vmem:[#allocation2 + $0x1a0] sm:$0xff] %vm656_vm3, %v617_v2  ;;  %681 = vst.msk [vmem:[#allocation2 + $0xc0] sm:$0xff] %vm656_vm3, %v477_v3  ;;  %v1021_v61 = vld [vmem:[#allocation2 + $0x80] sm:$0xff]  ;;  %v724_v63 = vld [vmem:[#allocation3 + $0x38] sm:$0xff] }
 0x11a   :  { %1298 = vmatprep.subr.mxu1 %v2570_v0  ;;  %1715 = vmatprep.subr.mxu0 %v2570_v0  ;;  %v2498_v6 = vpop.f32.mrf.mxu1  ;;  %v2456_v7 = vpop.f32.mrf.mxu0  ;;  %v1028_v44 = vld [vmem:[#allocation2 + $0xb8] sm:$0xff]  ;;  %v1053_v62 = vld [vmem:[#allocation2 + $0x180] sm:$0xff]  ;;  %v723_v2 = vld [vmem:[#allocation3 + $0x30] sm:$0xff] }
 0x11b   :  { %1299 = vmatpush1.msra.mxu1 %v1012_v4  ;;  %1716 = vmatpush1.msra.mxu0 %v1048_v5  ;;  %712 = vst.msk [vmem:[#allocation2 + $0x1b8] sm:$0xff] %vm656_vm3, %v2498_v6  ;;  %684 = vst.msk [vmem:[#allocation2 + $0xd8] sm:$0xff] %vm656_vm3, %v2456_v7  ;;  %v1056_v53 = vld [vmem:[#allocation2 + $0x198] sm:$0xff]  ;;  %v721_v1 = vld [vmem:[#allocation3 + $0x20] sm:$0xff] }
 0x11c   :  { %1300 = vmatprep.subr.mxu1 %v2570_v0  ;;  %1717 = vmatprep.subr.mxu0 %v2570_v0  ;;  %v627_v10 = vpop.f32.mrf.mxu1  ;;  %v487_v11 = vpop.f32.mrf.mxu0  ;;  %v1027_v46 = vld [vmem:[#allocation2 + $0xb0] sm:$0xff]  ;;  %v726_v3 = vld [vmem:[#allocation3 + $0x48] sm:$0xff]  ;;  %v728_v4 = vld [vmem:[#allocation3 + $0x58] sm:$0xff] }
 0x11d   :  { %1301 = vmatpush1.msra.mxu1 %v1011_v8  ;;  %1718 = vmatpush1.msra.mxu0 %v1047_v9  ;;  %711 = vst.msk [vmem:[#allocation2 + $0x1b0] sm:$0xff] %vm656_vm3, %v627_v10  ;;  %683 = vst.msk [vmem:[#allocation2 + $0xd0] sm:$0xff] %vm656_vm3, %v487_v11  ;;  %v1055_v55 = vld [vmem:[#allocation2 + $0x190] sm:$0xff]  ;;  %v730_v6 = vld [vmem:[#allocation3 + $0x68] sm:$0xff] }
 0x11e   :  { %1302 = vmatprep.subr.mxu1 %v2570_v0  ;;  %1719 = vmatprep.subr.mxu0 %v2570_v0  ;;  %v2501_v14 = vpop.f32.mrf.mxu1  ;;  %v1030_v40 = vld [vmem:[#allocation2 + $0xc8] sm:$0xff]  ;;  %v727_v5 = vld [vmem:[#allocation3 + $0x50] sm:$0xff]  ;;  %v732_v7 = vld [vmem:[#allocation3 + $0x78] sm:$0xff] }
 0x11f   :  { %1303 = vmatpush1.msra.mxu1 %v1010_v12  ;;  %1720 = vmatpush1.msra.mxu0 %v1046_v13  ;;  %714 = vst.msk [vmem:[#allocation2 + $0x1c8] sm:$0xff] %vm656_vm3, %v2501_v14  ;;  %v1058_v49 = vld [vmem:[#allocation2 + $0x1a8] sm:$0xff]  ;;  %v729_v8 = vld [vmem:[#allocation3 + $0x60] sm:$0xff]  ;;  %v731_v9 = vld [vmem:[#allocation3 + $0x70] sm:$0xff] }
 0x120   :  { %1304 = vmatprep.subr.mxu1 %v2570_v0  ;;  %1721 = vmatprep.subr.mxu0 %v2570_v0  ;;  %v637_v17 = vpop.f32.mrf.mxu1  ;;  %v1029_v42 = vld [vmem:[#allocation2 + $0xc0] sm:$0xff]  ;;  %v734_v10 = vld [vmem:[#allocation3 + $0x88] sm:$0xff]  ;;  %v736_v11 = vld [vmem:[#allocation3 + $0x98] sm:$0xff] }
 0x121   :  { %1305 = vmatpush1.msra.mxu1 %v1009_v15  ;;  %1722 = vmatpush1.msra.mxu0 %v1045_v16  ;;  %713 = vst.msk [vmem:[#allocation2 + $0x1c0] sm:$0xff] %vm656_vm3, %v637_v17  ;;  %v1057_v51 = vld [vmem:[#allocation2 + $0x1a0] sm:$0xff]  ;;  %v735_v13 = vld [vmem:[#allocation3 + $0x90] sm:$0xff]  ;;  %v738_v14 = vld [vmem:[#allocation3 + $0xa8] sm:$0xff] }
 0x122   :  { %1306 = vmatprep.subr.mxu1 %v2570_v0  ;;  %1723 = vmatprep.subr.mxu0 %v2570_v0  ;;  %v2504_v20 = vpop.f32.mrf.mxu1  ;;  %v1032_v36 = vld [vmem:[#allocation2 + $0xd8] sm:$0xff]  ;;  %v733_v12 = vld [vmem:[#allocation3 + $0x80] sm:$0xff]  ;;  %v739_v17 = vld [vmem:[#allocation3 + $0xb0] sm:$0xff] }
 0x123   :  { %1307 = vmatpush1.msra.mxu1 %v1008_v18  ;;  %1724 = vmatpush1.msra.mxu0 %v1044_v19  ;;  %716 = vst.msk [vmem:[#allocation2 + $0x1d8] sm:$0xff] %vm656_vm3, %v2504_v20  ;;  %v1060_v45 = vld [vmem:[#allocation2 + $0x1b8] sm:$0xff]  ;;  %v737_v16 = vld [vmem:[#allocation3 + $0xa0] sm:$0xff]  ;;  %v742_v18 = vld [vmem:[#allocation3 + $0xc8] sm:$0xff] }
 0x124   :  { %1308 = vmatprep.subr.mxu1 %v2570_v0  ;;  %1725 = vmatprep.subr.mxu0 %v2570_v0  ;;  %v647_v23 = vpop.f32.mrf.mxu1  ;;  %v1031_v38 = vld [vmem:[#allocation2 + $0xd0] sm:$0xff]  ;;  %v740_v15 = vld [vmem:[#allocation3 + $0xb8] sm:$0xff]  ;;  %v741_v20 = vld [vmem:[#allocation3 + $0xc0] sm:$0xff] }
 0x125   :  { %1309 = vmatpush1.msra.mxu1 %v1007_v21  ;;  %1726 = vmatpush1.msra.mxu0 %v1043_v22  ;;  %715 = vst.msk [vmem:[#allocation2 + $0x1d0] sm:$0xff] %vm656_vm3, %v647_v23  ;;  %v1059_v47 = vld [vmem:[#allocation2 + $0x1b0] sm:$0xff]  ;;  %v744_v19 = vld [vmem:[#allocation3 + $0xd8] sm:$0xff]  ;;  %v746_v22 = vld [vmem:[#allocation3 + $0xe8] sm:$0xff] }
 0x126   :  { %1310 = vmatprep.subr.mxu1 %v2570_v0  ;;  %1727 = vmatprep.subr.mxu0 %v2570_v0  ;;  %v1062_v41 = vld [vmem:[#allocation2 + $0x1c8] sm:$0xff]  ;;  %v743_v21 = vld [vmem:[#allocation3 + $0xd0] sm:$0xff]  ;;  %v748_v23 = vld [vmem:[#allocation3 + $0xf8] sm:$0xff] }
 0x127   :  { %1311 = vmatpush1.msra.mxu1 %v1006_v24  ;;  %1728 = vmatpush1.msra.mxu0 %v1042_v25  ;;  %v745_v24 = vld [vmem:[#allocation3 + $0xe0] sm:$0xff]  ;;  %v747_v25 = vld [vmem:[#allocation3 + $0xf0] sm:$0xff] }
 0x128   :  { %1312 = vmatprep.subr.mxu1 %v2570_v0  ;;  %1729 = vmatprep.subr.mxu0 %v2570_v0  ;;  %v1061_v43 = vld [vmem:[#allocation2 + $0x1c0] sm:$0xff] }
 0x129   :  { %1313 = vmatpush1.msra.mxu1 %v1005_v26  ;;  %1730 = vmatpush1.msra.mxu0 %v1041_v27  ;;  %v750_v26 = vld [vmem:[#allocation3 + $0x108] sm:$0xff]  ;;  %v752_v27 = vld [vmem:[#allocation3 + $0x118] sm:$0xff] }
 0x12a   :  { %1314 = vmatprep.subr.mxu1 %v2570_v0  ;;  %1731 = vmatprep.subr.mxu0 %v2570_v0  ;;  %v1064_v37 = vld [vmem:[#allocation2 + $0x1d8] sm:$0xff] }
 0x12b   :  { %1315 = vmatpush2.msra.mxu1 %v1036_v28  ;;  %1732 = vmatpush1.msra.mxu0 %v1040_v29  ;;  %v749_v28 = vld [vmem:[#allocation3 + $0x100] sm:$0xff]  ;;  %v751_v29 = vld [vmem:[#allocation3 + $0x110] sm:$0xff] }
 0x12c   :  { %1316 = vmatprep.subr.mxu1 %v2570_v0  ;;  %1733 = vmatprep.subr.mxu0 %v2570_v0  ;;  %v1063_v39 = vld [vmem:[#allocation2 + $0x1d0] sm:$0xff] }
 0x12d   :  { %1317 = vmatpush2.msra.mxu1 %v1035_v30  ;;  %1734 = vmatpush1.msra.mxu0 %v1039_v31  ;;  %v754_v30 = vld [vmem:[#allocation3 + $0x128] sm:$0xff]  ;;  %v756_v31 = vld [vmem:[#allocation3 + $0x138] sm:$0xff] }
 0x12e   :  { %1318 = vmatprep.subr.mxu1 %v2570_v0  ;;  %1735 = vmatprep.subr.mxu0 %v2570_v0 }
 0x12f   :  { %1319 = vmatpush2.msra.mxu1 %v1034_v32  ;;  %1736 = vmatpush1.msra.mxu0 %v1038_v33  ;;  %v753_v32 = vld [vmem:[#allocation3 + $0x120] sm:$0xff]  ;;  %v755_v33 = vld [vmem:[#allocation3 + $0x130] sm:$0xff] }
 0x130   :  { %1320 = vmatprep.subr.mxu1 %v2570_v0  ;;  %1737 = vmatprep.subr.mxu0 %v2570_v0 }
 0x131   :  { %1321 = vmatpush2.msra.mxu1 %v1033_v34  ;;  %1738 = vmatpush1.msra.mxu0 %v1037_v35  ;;  %v758_v34 = vld [vmem:[#allocation3 + $0x148] sm:$0xff]  ;;  %v760_v35 = vld [vmem:[#allocation3 + $0x158] sm:$0xff] }
 0x132   :  { %1322 = vmatprep.subr.mxu1 %v2570_v0  ;;  %1747 = vmatprep.subr.mxu0 %v2570_v0 }
 0x133   :  { %1323 = vmatpush2.msra.mxu1 %v1032_v36  ;;  %1748 = vmatpush2.msra.mxu0 %v1064_v37  ;;  %v757_v36 = vld [vmem:[#allocation3 + $0x140] sm:$0xff]  ;;  %v759_v37 = vld [vmem:[#allocation3 + $0x150] sm:$0xff] }
 0x134   :  { %1324 = vmatprep.subr.mxu1 %v2570_v0  ;;  %1749 = vmatprep.subr.mxu0 %v2570_v0 }
 0x135   :  { %1325 = vmatpush2.msra.mxu1 %v1031_v38  ;;  %1750 = vmatpush2.msra.mxu0 %v1063_v39  ;;  %v762_v38 = vld [vmem:[#allocation3 + $0x168] sm:$0xff]  ;;  %v764_v39 = vld [vmem:[#allocation3 + $0x178] sm:$0xff] }
 0x136   :  { %1326 = vmatprep.subr.mxu1 %v2570_v0  ;;  %1751 = vmatprep.subr.mxu0 %v2570_v0 }
 0x137   :  { %1327 = vmatpush2.msra.mxu1 %v1030_v40  ;;  %1752 = vmatpush2.msra.mxu0 %v1062_v41  ;;  %v761_v40 = vld [vmem:[#allocation3 + $0x160] sm:$0xff]  ;;  %v763_v41 = vld [vmem:[#allocation3 + $0x170] sm:$0xff] }
 0x138   :  { %1328 = vmatprep.subr.mxu1 %v2570_v0  ;;  %1753 = vmatprep.subr.mxu0 %v2570_v0 }
 0x139   :  { %1329 = vmatpush2.msra.mxu1 %v1029_v42  ;;  %1754 = vmatpush2.msra.mxu0 %v1061_v43  ;;  %v766_v42 = vld [vmem:[#allocation3 + $0x188] sm:$0xff]  ;;  %v768_v43 = vld [vmem:[#allocation3 + $0x198] sm:$0xff] }
 0x13a   :  { %1330 = vmatprep.subr.mxu1 %v2570_v0  ;;  %1755 = vmatprep.subr.mxu0 %v2570_v0 }
 0x13b   :  { %1331 = vmatpush2.msra.mxu1 %v1028_v44  ;;  %1756 = vmatpush2.msra.mxu0 %v1060_v45  ;;  %v765_v44 = vld [vmem:[#allocation3 + $0x180] sm:$0xff]  ;;  %v767_v45 = vld [vmem:[#allocation3 + $0x190] sm:$0xff] }
 0x13c   :  { %1332 = vmatprep.subr.mxu1 %v2570_v0  ;;  %1757 = vmatprep.subr.mxu0 %v2570_v0 }
 0x13d   :  { %1333 = vmatpush2.msra.mxu1 %v1027_v46  ;;  %1758 = vmatpush2.msra.mxu0 %v1059_v47  ;;  %v770_v46 = vld [vmem:[#allocation3 + $0x1a8] sm:$0xff]  ;;  %v772_v47 = vld [vmem:[#allocation3 + $0x1b8] sm:$0xff] }
 0x13e   :  { %1334 = vmatprep.subr.mxu1 %v2570_v0  ;;  %1759 = vmatprep.subr.mxu0 %v2570_v0 }
 0x13f   :  { %1335 = vmatpush2.msra.mxu1 %v1026_v48  ;;  %1760 = vmatpush2.msra.mxu0 %v1058_v49  ;;  %v769_v48 = vld [vmem:[#allocation3 + $0x1a0] sm:$0xff]  ;;  %v771_v49 = vld [vmem:[#allocation3 + $0x1b0] sm:$0xff] }
 0x140   :  { %1336 = vmatprep.subr.mxu1 %v2570_v0  ;;  %1761 = vmatprep.subr.mxu0 %v2570_v0 }
 0x141   :  { %1337 = vmatpush2.msra.mxu1 %v1025_v50  ;;  %1762 = vmatpush2.msra.mxu0 %v1057_v51  ;;  %v774_v50 = vld [vmem:[#allocation3 + $0x1c8] sm:$0xff]  ;;  %v776_v51 = vld [vmem:[#allocation3 + $0x1d8] sm:$0xff] }
 0x142   :  { %1338 = vmatprep.subr.mxu1 %v2570_v0  ;;  %1763 = vmatprep.subr.mxu0 %v2570_v0 }
 0x143   :  { %1339 = vmatpush2.msra.mxu1 %v1024_v52  ;;  %1764 = vmatpush2.msra.mxu0 %v1056_v53  ;;  %v773_v52 = vld [vmem:[#allocation3 + $0x1c0] sm:$0xff]  ;;  %v775_v53 = vld [vmem:[#allocation3 + $0x1d0] sm:$0xff] }
 0x144   :  { %1340 = vmatprep.subr.mxu1 %v2570_v0  ;;  %1765 = vmatprep.subr.mxu0 %v2570_v0 }
 0x145   :  { %1341 = vmatpush2.msra.mxu1 %v1023_v54  ;;  %1766 = vmatpush2.msra.mxu0 %v1055_v55  ;;  %v778_v54 = vld [vmem:[#allocation3 + $0x1e8] sm:$0xff]  ;;  %v780_v55 = vld [vmem:[#allocation3 + $0x1f8] sm:$0xff] }
 0x146   :  { %1342 = vmatprep.subr.mxu1 %v2570_v0  ;;  %1767 = vmatprep.subr.mxu0 %v2570_v0 }
 0x147   :  { %1343 = vmatpush2.msra.mxu1 %v1022_v56  ;;  %1768 = vmatpush2.msra.mxu0 %v1054_v57  ;;  %v777_v56 = vld [vmem:[#allocation3 + $0x1e0] sm:$0xff]  ;;  %v779_v57 = vld [vmem:[#allocation3 + $0x1f0] sm:$0xff] }
 0x148   :  { %1344 = vmatprep.subr.mxu1 %v2570_v0  ;;  %1769 = vmatprep.subr.mxu0 %v2570_v0  ;;  %v725_v0 = vld [vmem:[#allocation3 + $0x40] sm:$0xff] }
 0x149   :  { %1345 = vmatpush2.msra.mxu1 %v1021_v61  ;;  %1770 = vmatpush2.msra.mxu0 %v1053_v62  ;;  %v783_v61 = vld [vmem:[#allocation3 + $0x210] sm:$0xff]  ;;  %v786_v62 = vld [vmem:[#allocation3 + $0x228] sm:$0xff] }
 0x14a   :  { %1347 = vmatmul.mubr.f32.vlgmr.msra.gmra.mxu1 %v717_v58  ;;  %1772 = vmatmul.mubr.f32.vlgmr.msra.gmra.mxu0 %v719_v59  ;;  %v782_v58 = vld [vmem:[#allocation3 + $0x208] sm:$0xff]  ;;  %v784_v59 = vld [vmem:[#allocation3 + $0x218] sm:$0xff] }
 0x14b   :  { %1351 = vmatprep.mubr.f32.mxu1 %v722_v60  ;;  %2272 = vmatprep.mubr.msk.f32.mxu0 %vm1065_vm2, %v724_v63  ;;  %v781_v60 = vld [vmem:[#allocation3 + $0x200] sm:$0xff]  ;;  %v788_v63 = vld [vmem:[#allocation3 + $0x238] sm:$0xff] }
 0x14e   :  { %1352 = vmatmul.mubr.f32.gmra.mxu1 %v721_v1  ;;  %1777 = vmatmul.mubr.f32.gmra.mxu0 %v723_v2  ;;  %v785_v1 = vld [vmem:[#allocation3 + $0x220] sm:$0xff]  ;;  %v787_v2 = vld [vmem:[#allocation3 + $0x230] sm:$0xff] }
 0x14f   :  { %1356 = vmatprep.mubr.f32.mxu1 %v726_v3  ;;  %2273 = vmatprep.mubr.msk.f32.mxu0 %vm1065_vm2, %v728_v4  ;;  %v790_v3 = vld [vmem:[#allocation3 + $0x248] sm:$0xff]  ;;  %v792_v4 = vld [vmem:[#allocation3 + $0x258] sm:$0xff] }
 0x152   :  { %1357 = vmatmul.mubr.f32.gmra.mxu1 %v725_v0  ;;  %1782 = vmatmul.mubr.f32.gmra.mxu0 %v727_v5  ;;  %v789_v0 = vld [vmem:[#allocation3 + $0x240] sm:$0xff]  ;;  %v791_v5 = vld [vmem:[#allocation3 + $0x250] sm:$0xff] }
 0x153   :  { %1361 = vmatprep.mubr.f32.mxu1 %v730_v6  ;;  %2274 = vmatprep.mubr.msk.f32.mxu0 %vm1065_vm2, %v732_v7  ;;  %v794_v6 = vld [vmem:[#allocation3 + $0x268] sm:$0xff]  ;;  %v796_v7 = vld [vmem:[#allocation3 + $0x278] sm:$0xff] }
 0x156   :  { %1362 = vmatmul.mubr.f32.gmra.mxu1 %v729_v8  ;;  %1787 = vmatmul.mubr.f32.gmra.mxu0 %v731_v9  ;;  %v793_v8 = vld [vmem:[#allocation3 + $0x260] sm:$0xff]  ;;  %v795_v9 = vld [vmem:[#allocation3 + $0x270] sm:$0xff] }
 0x157   :  { %1366 = vmatprep.mubr.f32.mxu1 %v734_v10  ;;  %2275 = vmatprep.mubr.msk.f32.mxu0 %vm1065_vm2, %v736_v11  ;;  %v798_v10 = vld [vmem:[#allocation3 + $0x288] sm:$0xff]  ;;  %v800_v11 = vld [vmem:[#allocation3 + $0x298] sm:$0xff] }
 0x15a   :  { %1367 = vmatmul.mubr.f32.gmra.mxu1 %v733_v12  ;;  %1792 = vmatmul.mubr.f32.gmra.mxu0 %v735_v13  ;;  %v797_v12 = vld [vmem:[#allocation3 + $0x280] sm:$0xff]  ;;  %v799_v13 = vld [vmem:[#allocation3 + $0x290] sm:$0xff] }
 0x15b   :  { %1371 = vmatprep.mubr.f32.mxu1 %v738_v14  ;;  %2276 = vmatprep.mubr.msk.f32.mxu0 %vm1065_vm2, %v740_v15  ;;  %v802_v14 = vld [vmem:[#allocation3 + $0x2a8] sm:$0xff]  ;;  %v804_v15 = vld [vmem:[#allocation3 + $0x2b8] sm:$0xff] }
 0x15e   :  { %1372 = vmatmul.mubr.f32.gmra.mxu1 %v737_v16  ;;  %1797 = vmatmul.mubr.f32.gmra.mxu0 %v739_v17  ;;  %v801_v16 = vld [vmem:[#allocation3 + $0x2a0] sm:$0xff]  ;;  %v803_v17 = vld [vmem:[#allocation3 + $0x2b0] sm:$0xff] }
 0x15f   :  { %1376 = vmatprep.mubr.f32.mxu1 %v742_v18  ;;  %2277 = vmatprep.mubr.msk.f32.mxu0 %vm1065_vm2, %v744_v19  ;;  %v806_v18 = vld [vmem:[#allocation3 + $0x2c8] sm:$0xff]  ;;  %v808_v19 = vld [vmem:[#allocation3 + $0x2d8] sm:$0xff] }
 0x162   :  { %1377 = vmatmul.mubr.f32.gmra.mxu1 %v741_v20  ;;  %1802 = vmatmul.mubr.f32.gmra.mxu0 %v743_v21  ;;  %v805_v20 = vld [vmem:[#allocation3 + $0x2c0] sm:$0xff]  ;;  %v807_v21 = vld [vmem:[#allocation3 + $0x2d0] sm:$0xff] }
 0x163   :  { %1381 = vmatprep.mubr.f32.mxu1 %v746_v22  ;;  %2278 = vmatprep.mubr.msk.f32.mxu0 %vm1065_vm2, %v748_v23  ;;  %v810_v22 = vld [vmem:[#allocation3 + $0x2e8] sm:$0xff]  ;;  %v812_v23 = vld [vmem:[#allocation3 + $0x2f8] sm:$0xff] }
 0x166   :  { %1382 = vmatmul.mubr.f32.gmra.mxu1 %v745_v24  ;;  %1807 = vmatmul.mubr.f32.gmra.mxu0 %v747_v25  ;;  %v809_v24 = vld [vmem:[#allocation3 + $0x2e0] sm:$0xff]  ;;  %v811_v25 = vld [vmem:[#allocation3 + $0x2f0] sm:$0xff] }
 0x167   :  { %1386 = vmatprep.mubr.f32.mxu1 %v750_v26  ;;  %2279 = vmatprep.mubr.msk.f32.mxu0 %vm1065_vm2, %v752_v27  ;;  %v814_v26 = vld [vmem:[#allocation3 + $0x308] sm:$0xff]  ;;  %v816_v27 = vld [vmem:[#allocation3 + $0x318] sm:$0xff] }
 0x16a   :  { %1387 = vmatmul.mubr.f32.gmra.mxu1 %v749_v28  ;;  %1812 = vmatmul.mubr.f32.gmra.mxu0 %v751_v29  ;;  %v813_v28 = vld [vmem:[#allocation3 + $0x300] sm:$0xff]  ;;  %v815_v29 = vld [vmem:[#allocation3 + $0x310] sm:$0xff] }
 0x16b   :  { %1391 = vmatprep.mubr.f32.mxu1 %v754_v30  ;;  %2280 = vmatprep.mubr.msk.f32.mxu0 %vm1065_vm2, %v756_v31  ;;  %v818_v30 = vld [vmem:[#allocation3 + $0x328] sm:$0xff]  ;;  %v820_v31 = vld [vmem:[#allocation3 + $0x338] sm:$0xff] }
 0x16e   :  { %1392 = vmatmul.mubr.f32.gmra.mxu1 %v753_v32  ;;  %1817 = vmatmul.mubr.f32.gmra.mxu0 %v755_v33  ;;  %v817_v32 = vld [vmem:[#allocation3 + $0x320] sm:$0xff]  ;;  %v819_v33 = vld [vmem:[#allocation3 + $0x330] sm:$0xff] }
 0x16f   :  { %1396 = vmatprep.mubr.f32.mxu1 %v758_v34  ;;  %2281 = vmatprep.mubr.msk.f32.mxu0 %vm1065_vm2, %v760_v35  ;;  %v822_v34 = vld [vmem:[#allocation3 + $0x348] sm:$0xff]  ;;  %v824_v35 = vld [vmem:[#allocation3 + $0x358] sm:$0xff] }
 0x172   :  { %1397 = vmatmul.mubr.f32.gmra.mxu1 %v757_v36  ;;  %1822 = vmatmul.mubr.f32.gmra.mxu0 %v759_v37  ;;  %v821_v36 = vld [vmem:[#allocation3 + $0x340] sm:$0xff]  ;;  %v823_v37 = vld [vmem:[#allocation3 + $0x350] sm:$0xff] }
 0x173   :  { %1401 = vmatprep.mubr.f32.mxu1 %v762_v38  ;;  %2282 = vmatprep.mubr.msk.f32.mxu0 %vm1065_vm2, %v764_v39  ;;  %v826_v38 = vld [vmem:[#allocation3 + $0x368] sm:$0xff]  ;;  %v828_v39 = vld [vmem:[#allocation3 + $0x378] sm:$0xff] }
 0x176   :  { %1402 = vmatmul.mubr.f32.gmra.mxu1 %v761_v40  ;;  %1827 = vmatmul.mubr.f32.gmra.mxu0 %v763_v41  ;;  %v825_v40 = vld [vmem:[#allocation3 + $0x360] sm:$0xff]  ;;  %v827_v41 = vld [vmem:[#allocation3 + $0x370] sm:$0xff] }
 0x177   :  { %1406 = vmatprep.mubr.f32.mxu1 %v766_v42  ;;  %2283 = vmatprep.mubr.msk.f32.mxu0 %vm1065_vm2, %v768_v43  ;;  %v830_v42 = vld [vmem:[#allocation3 + $0x388] sm:$0xff]  ;;  %v832_v43 = vld [vmem:[#allocation3 + $0x398] sm:$0xff] }
 0x17a   :  { %1407 = vmatmul.mubr.f32.gmra.mxu1 %v765_v44  ;;  %1832 = vmatmul.mubr.f32.gmra.mxu0 %v767_v45  ;;  %v829_v44 = vld [vmem:[#allocation3 + $0x380] sm:$0xff]  ;;  %v831_v45 = vld [vmem:[#allocation3 + $0x390] sm:$0xff] }
 0x17b   :  { %1411 = vmatprep.mubr.f32.mxu1 %v770_v46  ;;  %2284 = vmatprep.mubr.msk.f32.mxu0 %vm1065_vm2, %v772_v47  ;;  %v834_v46 = vld [vmem:[#allocation3 + $0x3a8] sm:$0xff]  ;;  %v836_v47 = vld [vmem:[#allocation3 + $0x3b8] sm:$0xff] }
 0x17e   :  { %1412 = vmatmul.mubr.f32.gmra.mxu1 %v769_v48  ;;  %1837 = vmatmul.mubr.f32.gmra.mxu0 %v771_v49  ;;  %v833_v48 = vld [vmem:[#allocation3 + $0x3a0] sm:$0xff]  ;;  %v835_v49 = vld [vmem:[#allocation3 + $0x3b0] sm:$0xff] }
 0x17f   :  { %1416 = vmatprep.mubr.f32.mxu1 %v774_v50  ;;  %2285 = vmatprep.mubr.msk.f32.mxu0 %vm1065_vm2, %v776_v51  ;;  %v838_v50 = vld [vmem:[#allocation3 + $0x3c8] sm:$0xff]  ;;  %v840_v51 = vld [vmem:[#allocation3 + $0x3d8] sm:$0xff] }
 0x182   :  { %1417 = vmatmul.mubr.f32.gmra.mxu1 %v773_v52  ;;  %1842 = vmatmul.mubr.f32.gmra.mxu0 %v775_v53  ;;  %v837_v52 = vld [vmem:[#allocation3 + $0x3c0] sm:$0xff]  ;;  %v839_v53 = vld [vmem:[#allocation3 + $0x3d0] sm:$0xff] }
 0x183   :  { %1421 = vmatprep.mubr.f32.mxu1 %v778_v54  ;;  %2286 = vmatprep.mubr.msk.f32.mxu0 %vm1065_vm2, %v780_v55  ;;  %v842_v54 = vld [vmem:[#allocation3 + $0x3e8] sm:$0xff]  ;;  %v844_v55 = vld [vmem:[#allocation3 + $0x3f8] sm:$0xff] }
 0x186   :  { %1422 = vmatmul.mubr.f32.gmra.mxu1 %v777_v56  ;;  %1847 = vmatmul.mubr.f32.gmra.mxu0 %v779_v57  ;;  %v841_v56 = vld [vmem:[#allocation3 + $0x3e0] sm:$0xff]  ;;  %v843_v57 = vld [vmem:[#allocation3 + $0x3f0] sm:$0xff] }
 0x187   :  { %1426 = vmatprep.mubr.f32.mxu1 %v782_v58  ;;  %2287 = vmatprep.mubr.msk.f32.mxu0 %vm1065_vm2, %v784_v59  ;;  %v846_v58 = vld [vmem:[#allocation3 + $0x408] sm:$0xff]  ;;  %v848_v59 = vld [vmem:[#allocation3 + $0x418] sm:$0xff] }
 0x18a   :  { %1427 = vmatmul.mubr.f32.gmra.mxu1 %v781_v60  ;;  %1852 = vmatmul.mubr.f32.gmra.mxu0 %v783_v61  ;;  %v845_v60 = vld [vmem:[#allocation3 + $0x400] sm:$0xff]  ;;  %v847_v61 = vld [vmem:[#allocation3 + $0x410] sm:$0xff] }
 0x18b   :  { %1431 = vmatprep.mubr.f32.mxu1 %v786_v62  ;;  %2288 = vmatprep.mubr.msk.f32.mxu0 %vm1065_vm2, %v788_v63  ;;  %v850_v62 = vld [vmem:[#allocation3 + $0x428] sm:$0xff]  ;;  %v852_v63 = vld [vmem:[#allocation3 + $0x438] sm:$0xff] }
 0x18e   :  { %1432 = vmatmul.mubr.f32.gmra.mxu1 %v785_v1  ;;  %1857 = vmatmul.mubr.f32.gmra.mxu0 %v787_v2  ;;  %v849_v1 = vld [vmem:[#allocation3 + $0x420] sm:$0xff]  ;;  %v851_v2 = vld [vmem:[#allocation3 + $0x430] sm:$0xff] }
 0x18f   :  { %1436 = vmatprep.mubr.f32.mxu1 %v790_v3  ;;  %2289 = vmatprep.mubr.msk.f32.mxu0 %vm1065_vm2, %v792_v4  ;;  %v854_v3 = vld [vmem:[#allocation3 + $0x448] sm:$0xff]  ;;  %v856_v4 = vld [vmem:[#allocation3 + $0x458] sm:$0xff] }
 0x192   :  { %1437 = vmatmul.mubr.f32.gmra.mxu1 %v789_v0  ;;  %1862 = vmatmul.mubr.f32.gmra.mxu0 %v791_v5  ;;  %v853_v0 = vld [vmem:[#allocation3 + $0x440] sm:$0xff]  ;;  %v855_v5 = vld [vmem:[#allocation3 + $0x450] sm:$0xff] }
 0x193   :  { %1441 = vmatprep.mubr.f32.mxu1 %v794_v6  ;;  %2290 = vmatprep.mubr.msk.f32.mxu0 %vm1065_vm2, %v796_v7  ;;  %v858_v6 = vld [vmem:[#allocation3 + $0x468] sm:$0xff]  ;;  %v860_v7 = vld [vmem:[#allocation3 + $0x478] sm:$0xff] }
 0x196   :  { %1442 = vmatmul.mubr.f32.gmra.mxu1 %v793_v8  ;;  %1867 = vmatmul.mubr.f32.gmra.mxu0 %v795_v9  ;;  %v857_v8 = vld [vmem:[#allocation3 + $0x460] sm:$0xff]  ;;  %v859_v9 = vld [vmem:[#allocation3 + $0x470] sm:$0xff] }
 0x197   :  { %1446 = vmatprep.mubr.f32.mxu1 %v798_v10  ;;  %2291 = vmatprep.mubr.msk.f32.mxu0 %vm1065_vm2, %v800_v11  ;;  %v862_v10 = vld [vmem:[#allocation3 + $0x488] sm:$0xff]  ;;  %v864_v11 = vld [vmem:[#allocation3 + $0x498] sm:$0xff] }
 0x19a   :  { %1447 = vmatmul.mubr.f32.gmra.mxu1 %v797_v12  ;;  %1872 = vmatmul.mubr.f32.gmra.mxu0 %v799_v13  ;;  %v861_v12 = vld [vmem:[#allocation3 + $0x480] sm:$0xff]  ;;  %v863_v13 = vld [vmem:[#allocation3 + $0x490] sm:$0xff] }
 0x19b   :  { %1451 = vmatprep.mubr.f32.mxu1 %v802_v14  ;;  %2292 = vmatprep.mubr.msk.f32.mxu0 %vm1065_vm2, %v804_v15  ;;  %v866_v14 = vld [vmem:[#allocation3 + $0x4a8] sm:$0xff]  ;;  %v868_v15 = vld [vmem:[#allocation3 + $0x4b8] sm:$0xff] }
 0x19e   :  { %1452 = vmatmul.mubr.f32.gmra.mxu1 %v801_v16  ;;  %1877 = vmatmul.mubr.f32.gmra.mxu0 %v803_v17  ;;  %v865_v16 = vld [vmem:[#allocation3 + $0x4a0] sm:$0xff]  ;;  %v867_v17 = vld [vmem:[#allocation3 + $0x4b0] sm:$0xff] }
 0x19f   :  { %1456 = vmatprep.mubr.f32.mxu1 %v806_v18  ;;  %2293 = vmatprep.mubr.msk.f32.mxu0 %vm1065_vm2, %v808_v19  ;;  %v870_v18 = vld [vmem:[#allocation3 + $0x4c8] sm:$0xff]  ;;  %v872_v19 = vld [vmem:[#allocation3 + $0x4d8] sm:$0xff] }
 0x1a2   :  { %1457 = vmatmul.mubr.f32.gmra.mxu1 %v805_v20  ;;  %1882 = vmatmul.mubr.f32.gmra.mxu0 %v807_v21  ;;  %v869_v20 = vld [vmem:[#allocation3 + $0x4c0] sm:$0xff]  ;;  %v871_v21 = vld [vmem:[#allocation3 + $0x4d0] sm:$0xff] }
 0x1a3   :  { %1461 = vmatprep.mubr.f32.mxu1 %v810_v22  ;;  %2294 = vmatprep.mubr.msk.f32.mxu0 %vm1065_vm2, %v812_v23  ;;  %v874_v22 = vld [vmem:[#allocation3 + $0x4e8] sm:$0xff]  ;;  %v876_v23 = vld [vmem:[#allocation3 + $0x4f8] sm:$0xff] }
 0x1a6   :  { %1462 = vmatmul.mubr.f32.gmra.mxu1 %v809_v24  ;;  %1887 = vmatmul.mubr.f32.gmra.mxu0 %v811_v25  ;;  %v873_v24 = vld [vmem:[#allocation3 + $0x4e0] sm:$0xff]  ;;  %v875_v25 = vld [vmem:[#allocation3 + $0x4f0] sm:$0xff] }
 0x1a7   :  { %1466 = vmatprep.mubr.f32.mxu1 %v814_v26  ;;  %2295 = vmatprep.mubr.msk.f32.mxu0 %vm1065_vm2, %v816_v27  ;;  %v878_v26 = vld [vmem:[#allocation3 + $0x508] sm:$0xff]  ;;  %v880_v27 = vld [vmem:[#allocation3 + $0x518] sm:$0xff] }
 0x1aa   :  { %1467 = vmatmul.mubr.f32.gmra.mxu1 %v813_v28  ;;  %1892 = vmatmul.mubr.f32.gmra.mxu0 %v815_v29  ;;  %v877_v28 = vld [vmem:[#allocation3 + $0x500] sm:$0xff]  ;;  %v879_v29 = vld [vmem:[#allocation3 + $0x510] sm:$0xff] }
 0x1ab   :  { %1471 = vmatprep.mubr.f32.mxu1 %v818_v30  ;;  %2296 = vmatprep.mubr.msk.f32.mxu0 %vm1065_vm2, %v820_v31  ;;  %v882_v30 = vld [vmem:[#allocation3 + $0x528] sm:$0xff]  ;;  %v884_v31 = vld [vmem:[#allocation3 + $0x538] sm:$0xff] }
 0x1ae   :  { %1472 = vmatmul.mubr.f32.gmra.mxu1 %v817_v32  ;;  %1897 = vmatmul.mubr.f32.gmra.mxu0 %v819_v33  ;;  %v881_v32 = vld [vmem:[#allocation3 + $0x520] sm:$0xff]  ;;  %v883_v33 = vld [vmem:[#allocation3 + $0x530] sm:$0xff] }
 0x1af   :  { %1476 = vmatprep.mubr.f32.mxu1 %v822_v34  ;;  %2297 = vmatprep.mubr.msk.f32.mxu0 %vm1065_vm2, %v824_v35  ;;  %v886_v34 = vld [vmem:[#allocation3 + $0x548] sm:$0xff]  ;;  %v888_v35 = vld [vmem:[#allocation3 + $0x558] sm:$0xff] }
 0x1b2   :  { %1477 = vmatmul.mubr.f32.gmra.mxu1 %v821_v36  ;;  %1902 = vmatmul.mubr.f32.gmra.mxu0 %v823_v37  ;;  %v885_v36 = vld [vmem:[#allocation3 + $0x540] sm:$0xff]  ;;  %v887_v37 = vld [vmem:[#allocation3 + $0x550] sm:$0xff] }
 0x1b3   :  { %1481 = vmatprep.mubr.f32.mxu1 %v826_v38  ;;  %2298 = vmatprep.mubr.msk.f32.mxu0 %vm1065_vm2, %v828_v39  ;;  %v890_v38 = vld [vmem:[#allocation3 + $0x568] sm:$0xff]  ;;  %v892_v39 = vld [vmem:[#allocation3 + $0x578] sm:$0xff] }
 0x1b6   :  { %1482 = vmatmul.mubr.f32.gmra.mxu1 %v825_v40  ;;  %1907 = vmatmul.mubr.f32.gmra.mxu0 %v827_v41  ;;  %v889_v40 = vld [vmem:[#allocation3 + $0x560] sm:$0xff]  ;;  %v891_v41 = vld [vmem:[#allocation3 + $0x570] sm:$0xff] }
 0x1b7   :  { %1486 = vmatprep.mubr.f32.mxu1 %v830_v42  ;;  %2299 = vmatprep.mubr.msk.f32.mxu0 %vm1065_vm2, %v832_v43  ;;  %v894_v42 = vld [vmem:[#allocation3 + $0x588] sm:$0xff]  ;;  %v896_v43 = vld [vmem:[#allocation3 + $0x598] sm:$0xff] }
 0x1ba   :  { %1487 = vmatmul.mubr.f32.gmra.mxu1 %v829_v44  ;;  %1912 = vmatmul.mubr.f32.gmra.mxu0 %v831_v45  ;;  %v893_v44 = vld [vmem:[#allocation3 + $0x580] sm:$0xff]  ;;  %v895_v45 = vld [vmem:[#allocation3 + $0x590] sm:$0xff] }
 0x1bb   :  { %1491 = vmatprep.mubr.f32.mxu1 %v834_v46  ;;  %2300 = vmatprep.mubr.msk.f32.mxu0 %vm1065_vm2, %v836_v47  ;;  %v898_v46 = vld [vmem:[#allocation3 + $0x5a8] sm:$0xff]  ;;  %v900_v47 = vld [vmem:[#allocation3 + $0x5b8] sm:$0xff] }
 0x1be   :  { %1492 = vmatmul.mubr.f32.gmra.mxu1 %v833_v48  ;;  %1917 = vmatmul.mubr.f32.gmra.mxu0 %v835_v49  ;;  %v897_v48 = vld [vmem:[#allocation3 + $0x5a0] sm:$0xff]  ;;  %v899_v49 = vld [vmem:[#allocation3 + $0x5b0] sm:$0xff] }
 0x1bf   :  { %1496 = vmatprep.mubr.f32.mxu1 %v838_v50  ;;  %2301 = vmatprep.mubr.msk.f32.mxu0 %vm1065_vm2, %v840_v51  ;;  %v902_v50 = vld [vmem:[#allocation3 + $0x5c8] sm:$0xff]  ;;  %v904_v51 = vld [vmem:[#allocation3 + $0x5d8] sm:$0xff] }
 0x1c2   :  { %1497 = vmatmul.mubr.f32.gmra.mxu1 %v837_v52  ;;  %1922 = vmatmul.mubr.f32.gmra.mxu0 %v839_v53  ;;  %v901_v52 = vld [vmem:[#allocation3 + $0x5c0] sm:$0xff]  ;;  %v903_v53 = vld [vmem:[#allocation3 + $0x5d0] sm:$0xff] }
 0x1c3   :  { %1501 = vmatprep.mubr.f32.mxu1 %v842_v54  ;;  %2302 = vmatprep.mubr.msk.f32.mxu0 %vm1065_vm2, %v844_v55  ;;  %v906_v54 = vld [vmem:[#allocation3 + $0x5e8] sm:$0xff]  ;;  %v908_v55 = vld [vmem:[#allocation3 + $0x5f8] sm:$0xff] }
 0x1c6   :  { %1502 = vmatmul.mubr.f32.gmra.mxu1 %v841_v56  ;;  %1927 = vmatmul.mubr.f32.gmra.mxu0 %v843_v57  ;;  %v905_v56 = vld [vmem:[#allocation3 + $0x5e0] sm:$0xff]  ;;  %v907_v57 = vld [vmem:[#allocation3 + $0x5f0] sm:$0xff] }
 0x1c7   :  { %1506 = vmatprep.mubr.f32.mxu1 %v846_v58  ;;  %2303 = vmatprep.mubr.msk.f32.mxu0 %vm1065_vm2, %v848_v59  ;;  %v910_v58 = vld [vmem:[#allocation3 + $0x608] sm:$0xff]  ;;  %v912_v59 = vld [vmem:[#allocation3 + $0x618] sm:$0xff] }
 0x1ca   :  { %1507 = vmatmul.mubr.f32.gmra.mxu1 %v845_v60  ;;  %1932 = vmatmul.mubr.f32.gmra.mxu0 %v847_v61  ;;  %v909_v60 = vld [vmem:[#allocation3 + $0x600] sm:$0xff]  ;;  %v911_v61 = vld [vmem:[#allocation3 + $0x610] sm:$0xff] }
 0x1cb   :  { %1511 = vmatprep.mubr.f32.mxu1 %v850_v62  ;;  %2304 = vmatprep.mubr.msk.f32.mxu0 %vm1065_vm2, %v852_v63  ;;  %v914_v62 = vld [vmem:[#allocation3 + $0x628] sm:$0xff]  ;;  %v916_v63 = vld [vmem:[#allocation3 + $0x638] sm:$0xff] }
 0x1ce   :  { %1512 = vmatmul.mubr.f32.gmra.mxu1 %v849_v1  ;;  %1937 = vmatmul.mubr.f32.gmra.mxu0 %v851_v2 }
 0x1cf   :  { %1516 = vmatprep.mubr.f32.mxu1 %v854_v3  ;;  %2305 = vmatprep.mubr.msk.f32.mxu0 %vm1065_vm2, %v856_v4  ;;  %v913_v4 = vld [vmem:[#allocation3 + $0x620] sm:$0xff] }
 0x1d2   :  { %1517 = vmatmul.mubr.f32.gmra.mxu1 %v853_v0  ;;  %1942 = vmatmul.mubr.f32.gmra.mxu0 %v855_v5  ;;  %v915_v0 = vld [vmem:[#allocation3 + $0x630] sm:$0xff] }
 0x1d3   :  { %1521 = vmatprep.mubr.f32.mxu1 %v858_v6  ;;  %2306 = vmatprep.mubr.msk.f32.mxu0 %vm1065_vm2, %v860_v7  ;;  %v918_v7 = vld [vmem:[#allocation3 + $0x648] sm:$0xff] }
 0x1d6   :  { %1522 = vmatmul.mubr.f32.gmra.mxu1 %v857_v8  ;;  %1947 = vmatmul.mubr.f32.gmra.mxu0 %v859_v9  ;;  %v920_v8 = vld [vmem:[#allocation3 + $0x658] sm:$0xff] }
 0x1d7   :  { %1526 = vmatprep.mubr.f32.mxu1 %v862_v10  ;;  %2307 = vmatprep.mubr.msk.f32.mxu0 %vm1065_vm2, %v864_v11 }
 0x1da   :  { %1527 = vmatmul.mubr.f32.gmra.mxu1 %v861_v12  ;;  %1952 = vmatmul.mubr.f32.gmra.mxu0 %v863_v13  ;;  %v917_v12 = vld [vmem:[#allocation3 + $0x640] sm:$0xff]  ;;  %v919_v13 = vld [vmem:[#allocation3 + $0x650] sm:$0xff] }
 0x1db   :  { %1531 = vmatprep.mubr.f32.mxu1 %v866_v14  ;;  %2308 = vmatprep.mubr.msk.f32.mxu0 %vm1065_vm2, %v868_v15 }
 0x1de   :  { %1532 = vmatmul.mubr.f32.gmra.mxu1 %v865_v16  ;;  %1957 = vmatmul.mubr.f32.gmra.mxu0 %v867_v17  ;;  %v922_v16 = vld [vmem:[#allocation3 + $0x668] sm:$0xff]  ;;  %v924_v17 = vld [vmem:[#allocation3 + $0x678] sm:$0xff] }
 0x1df   :  { %1536 = vmatprep.mubr.f32.mxu1 %v870_v18  ;;  %2309 = vmatprep.mubr.msk.f32.mxu0 %vm1065_vm2, %v872_v19 }
 0x1e2   :  { %1537 = vmatmul.mubr.f32.gmra.mxu1 %v869_v20  ;;  %1962 = vmatmul.mubr.f32.gmra.mxu0 %v871_v21  ;;  %v921_v21 = vld [vmem:[#allocation3 + $0x660] sm:$0xff] }
 0x1e3   :  { %1541 = vmatprep.mubr.f32.mxu1 %v874_v22  ;;  %2310 = vmatprep.mubr.msk.f32.mxu0 %vm1065_vm2, %v876_v23  ;;  %v923_v22 = vld [vmem:[#allocation3 + $0x670] sm:$0xff] }
 0x1e6   :  { %1542 = vmatmul.mubr.f32.gmra.mxu1 %v873_v24  ;;  %1967 = vmatmul.mubr.f32.gmra.mxu0 %v875_v25  ;;  %v926_v25 = vld [vmem:[#allocation3 + $0x688] sm:$0xff] }
 0x1e7   :  { %1546 = vmatprep.mubr.f32.mxu1 %v878_v26  ;;  %2311 = vmatprep.mubr.msk.f32.mxu0 %vm1065_vm2, %v880_v27  ;;  %v928_v26 = vld [vmem:[#allocation3 + $0x698] sm:$0xff] }
 0x1ea   :  { %1547 = vmatmul.mubr.f32.gmra.mxu1 %v877_v28  ;;  %1972 = vmatmul.mubr.f32.gmra.mxu0 %v879_v29 }
 0x1eb   :  { %1551 = vmatprep.mubr.f32.mxu1 %v882_v30  ;;  %2312 = vmatprep.mubr.msk.f32.mxu0 %vm1065_vm2, %v884_v31  ;;  %v925_v30 = vld [vmem:[#allocation3 + $0x680] sm:$0xff]  ;;  %v927_v31 = vld [vmem:[#allocation3 + $0x690] sm:$0xff] }
 0x1ee   :  { %1552 = vmatmul.mubr.f32.gmra.mxu1 %v881_v32  ;;  %1977 = vmatmul.mubr.f32.gmra.mxu0 %v883_v33 }
 0x1ef   :  { %1556 = vmatprep.mubr.f32.mxu1 %v886_v34  ;;  %2313 = vmatprep.mubr.msk.f32.mxu0 %vm1065_vm2, %v888_v35  ;;  %v930_v34 = vld [vmem:[#allocation3 + $0x6a8] sm:$0xff]  ;;  %v932_v35 = vld [vmem:[#allocation3 + $0x6b8] sm:$0xff] }
 0x1f2   :  { %1557 = vmatmul.mubr.f32.gmra.mxu1 %v885_v36  ;;  %1982 = vmatmul.mubr.f32.gmra.mxu0 %v887_v37 }
 0x1f3   :  { %1561 = vmatprep.mubr.f32.mxu1 %v890_v38  ;;  %2314 = vmatprep.mubr.msk.f32.mxu0 %vm1065_vm2, %v892_v39  ;;  %v929_v39 = vld [vmem:[#allocation3 + $0x6a0] sm:$0xff] }
 0x1f6   :  { %1562 = vmatmul.mubr.f32.gmra.mxu1 %v889_v40  ;;  %1987 = vmatmul.mubr.f32.gmra.mxu0 %v891_v41  ;;  %v931_v40 = vld [vmem:[#allocation3 + $0x6b0] sm:$0xff] }
 0x1f7   :  { %1566 = vmatprep.mubr.f32.mxu1 %v894_v42  ;;  %2315 = vmatprep.mubr.msk.f32.mxu0 %vm1065_vm2, %v896_v43  ;;  %v934_v43 = vld [vmem:[#allocation3 + $0x6c8] sm:$0xff] }
 0x1fa   :  { %1567 = vmatmul.mubr.f32.gmra.mxu1 %v893_v44  ;;  %1992 = vmatmul.mubr.f32.gmra.mxu0 %v895_v45  ;;  %v936_v44 = vld [vmem:[#allocation3 + $0x6d8] sm:$0xff] }
 0x1fb   :  { %1571 = vmatprep.mubr.f32.mxu1 %v898_v46  ;;  %2316 = vmatprep.mubr.msk.f32.mxu0 %vm1065_vm2, %v900_v47 }
 0x1fe   :  { %1572 = vmatmul.mubr.f32.gmra.mxu1 %v897_v48  ;;  %1997 = vmatmul.mubr.f32.gmra.mxu0 %v899_v49  ;;  %v933_v48 = vld [vmem:[#allocation3 + $0x6c0] sm:$0xff]  ;;  %v935_v49 = vld [vmem:[#allocation3 + $0x6d0] sm:$0xff] }
 0x1ff   :  { %1576 = vmatprep.mubr.f32.mxu1 %v902_v50  ;;  %2317 = vmatprep.mubr.msk.f32.mxu0 %vm1065_vm2, %v904_v51 }
 0x202   :  { %1577 = vmatmul.mubr.f32.gmra.mxu1 %v901_v52  ;;  %2002 = vmatmul.mubr.f32.gmra.mxu0 %v903_v53  ;;  %v938_v52 = vld [vmem:[#allocation3 + $0x6e8] sm:$0xff]  ;;  %v940_v53 = vld [vmem:[#allocation3 + $0x6f8] sm:$0xff] }
 0x203   :  { %1581 = vmatprep.mubr.f32.mxu1 %v906_v54  ;;  %2318 = vmatprep.mubr.msk.f32.mxu0 %vm1065_vm2, %v908_v55 }
 0x206   :  { %1582 = vmatmul.mubr.f32.gmra.mxu1 %v905_v56  ;;  %2007 = vmatmul.mubr.f32.gmra.mxu0 %v907_v57  ;;  %v937_v57 = vld [vmem:[#allocation3 + $0x6e0] sm:$0xff] }
 0x207   :  { %1586 = vmatprep.mubr.f32.mxu1 %v910_v58  ;;  %2319 = vmatprep.mubr.msk.f32.mxu0 %vm1065_vm2, %v912_v59  ;;  %v939_v58 = vld [vmem:[#allocation3 + $0x6f0] sm:$0xff] }
 0x20a   :  { %v1348_v1 = vpop.f32.mrf.mxu1  ;;  %1587 = vmatmul.mubr.f32.gmra.mxu1 %v909_v60  ;;  %v1773_v2 = vpop.f32.mrf.mxu0  ;;  %2012 = vmatmul.mubr.f32.gmra.mxu0 %v911_v61  ;;  %v942_v61 = vld [vmem:[#allocation3 + $0x708] sm:$0xff] }
 0x20b   :  { %v1774_v3 = vadd.f32 %v1773_v2, %v1348_v1  ;;  %1591 = vmatprep.mubr.f32.mxu1 %v914_v62  ;;  %2320 = vmatprep.mubr.msk.f32.mxu0 %vm1065_vm2, %v916_v63  ;;  %v944_v62 = vld [vmem:[#allocation3 + $0x718] sm:$0xff] }
 0x20c   :  { %v1350_v5 = vpop.f32.mrf.mxu1  ;;  %v1775_v6 = vpop.f32.mrf.mxu0 }
 0x20d   :  { %2132 = vst.msk [vmem:[%s3320_s3] sm:$0xff] %vm656_vm3, %v1774_v3  ;;  %v941_v3 = vld [vmem:[#allocation3 + $0x700] sm:$0xff]  ;;  %v946_v6 = vld [vmem:[#allocation3 + $0x728] sm:$0xff] }
 0x20e   :  { %v1353_v9 = vpop.f32.mrf.mxu1  ;;  %1592 = vmatmul.mubr.f32.gmra.mxu1 %v913_v4  ;;  %v1778_v10 = vpop.f32.mrf.mxu0  ;;  %2017 = vmatmul.mubr.f32.gmra.mxu0 %v915_v0  ;;  %v943_v4 = vld [vmem:[#allocation3 + $0x710] sm:$0xff] }
 0x20f   :  { %v1779_v11 = vadd.f32 %v1778_v10, %v1353_v9  ;;  %1596 = vmatprep.mubr.f32.mxu1 %v918_v7  ;;  %2321 = vmatprep.mubr.msk.f32.mxu0 %vm1065_vm2, %v920_v8  ;;  %v948_v7 = vld [vmem:[#allocation3 + $0x738] sm:$0xff] }
 0x210   :  { %v1355_v14 = vpop.f32.mrf.mxu1  ;;  %v1780_v15 = vpop.f32.mrf.mxu0 }
 0x211   :  { %2133 = vst.msk [vmem:[%s3320_s3 + $0x8] sm:$0xff] %vm656_vm3, %v1779_v11  ;;  %v945_v11 = vld [vmem:[#allocation3 + $0x720] sm:$0xff]  ;;  %v950_v15 = vld [vmem:[#allocation3 + $0x748] sm:$0xff] }
 0x212   :  { %v1358_v18 = vpop.f32.mrf.mxu1  ;;  %1597 = vmatmul.mubr.f32.gmra.mxu1 %v917_v12  ;;  %v1783_v19 = vpop.f32.mrf.mxu0  ;;  %2022 = vmatmul.mubr.f32.gmra.mxu0 %v919_v13  ;;  %v947_v12 = vld [vmem:[#allocation3 + $0x730] sm:$0xff] }
 0x213   :  { %v1784_v20 = vadd.f32 %v1783_v19, %v1358_v18  ;;  %1601 = vmatprep.mubr.f32.mxu1 %v922_v16  ;;  %2322 = vmatprep.mubr.msk.f32.mxu0 %vm1065_vm2, %v924_v17  ;;  %v952_v16 = vld [vmem:[#allocation3 + $0x758] sm:$0xff] }
 0x214   :  { %v1360_v23 = vpop.f32.mrf.mxu1  ;;  %v1785_v24 = vpop.f32.mrf.mxu0 }
 0x215   :  { %2134 = vst.msk [vmem:[%s3320_s3 + $0x10] sm:$0xff] %vm656_vm3, %v1784_v20  ;;  %v949_v20 = vld [vmem:[#allocation3 + $0x740] sm:$0xff]  ;;  %v954_v24 = vld [vmem:[#allocation3 + $0x768] sm:$0xff] }
 0x216   :  { %v1363_v27 = vpop.f32.mrf.mxu1  ;;  %1602 = vmatmul.mubr.f32.gmra.mxu1 %v921_v21  ;;  %v1788_v28 = vpop.f32.mrf.mxu0  ;;  %2027 = vmatmul.mubr.f32.gmra.mxu0 %v923_v22  ;;  %v951_v21 = vld [vmem:[#allocation3 + $0x750] sm:$0xff] }
 0x217   :  { %v1789_v29 = vadd.f32 %v1788_v28, %v1363_v27  ;;  %1606 = vmatprep.mubr.f32.mxu1 %v926_v25  ;;  %2323 = vmatprep.mubr.msk.f32.mxu0 %vm1065_vm2, %v928_v26  ;;  %v956_v25 = vld [vmem:[#allocation3 + $0x778] sm:$0xff] }
 0x218   :  { %v1365_v32 = vpop.f32.mrf.mxu1  ;;  %v1790_v33 = vpop.f32.mrf.mxu0 }
 0x219   :  { %2135 = vst.msk [vmem:[%s3320_s3 + $0x18] sm:$0xff] %vm656_vm3, %v1789_v29  ;;  %v953_v29 = vld [vmem:[#allocation3 + $0x760] sm:$0xff]  ;;  %v958_v33 = vld [vmem:[#allocation3 + $0x788] sm:$0xff] }
 0x21a   :  { %v1368_v36 = vpop.f32.mrf.mxu1  ;;  %1607 = vmatmul.mubr.f32.gmra.mxu1 %v925_v30  ;;  %v1793_v37 = vpop.f32.mrf.mxu0  ;;  %2032 = vmatmul.mubr.f32.gmra.mxu0 %v927_v31  ;;  %v955_v30 = vld [vmem:[#allocation3 + $0x770] sm:$0xff] }
 0x21b   :  { %v1794_v38 = vadd.f32 %v1793_v37, %v1368_v36  ;;  %1611 = vmatprep.mubr.f32.mxu1 %v930_v34  ;;  %2324 = vmatprep.mubr.msk.f32.mxu0 %vm1065_vm2, %v932_v35  ;;  %v960_v34 = vld [vmem:[#allocation3 + $0x798] sm:$0xff] }
 0x21c   :  { %v1370_v41 = vpop.f32.mrf.mxu1  ;;  %v1795_v42 = vpop.f32.mrf.mxu0 }
 0x21d   :  { %2136 = vst.msk [vmem:[%s3320_s3 + $0x20] sm:$0xff] %vm656_vm3, %v1794_v38  ;;  %v957_v38 = vld [vmem:[#allocation3 + $0x780] sm:$0xff]  ;;  %v962_v42 = vld [vmem:[#allocation3 + $0x7a8] sm:$0xff] }
 0x21e   :  { %v1373_v45 = vpop.f32.mrf.mxu1  ;;  %1612 = vmatmul.mubr.f32.gmra.mxu1 %v929_v39  ;;  %v1798_v46 = vpop.f32.mrf.mxu0  ;;  %2037 = vmatmul.mubr.f32.gmra.mxu0 %v931_v40  ;;  %v959_v39 = vld [vmem:[#allocation3 + $0x790] sm:$0xff] }
 0x21f   :  { %v1799_v47 = vadd.f32 %v1798_v46, %v1373_v45  ;;  %1616 = vmatprep.mubr.f32.mxu1 %v934_v43  ;;  %2325 = vmatprep.mubr.msk.f32.mxu0 %vm1065_vm2, %v936_v44  ;;  %v964_v43 = vld [vmem:[#allocation3 + $0x7b8] sm:$0xff] }
 0x220   :  { %v1375_v50 = vpop.f32.mrf.mxu1  ;;  %v1800_v51 = vpop.f32.mrf.mxu0 }
 0x221   :  { %2137 = vst.msk [vmem:[%s3320_s3 + $0x28] sm:$0xff] %vm656_vm3, %v1799_v47  ;;  %v961_v47 = vld [vmem:[#allocation3 + $0x7a0] sm:$0xff]  ;;  %v966_v51 = vld [vmem:[#allocation3 + $0x7c8] sm:$0xff] }
 0x222   :  { %v1378_v54 = vpop.f32.mrf.mxu1  ;;  %1617 = vmatmul.mubr.f32.gmra.mxu1 %v933_v48  ;;  %v1803_v55 = vpop.f32.mrf.mxu0  ;;  %2042 = vmatmul.mubr.f32.gmra.mxu0 %v935_v49  ;;  %v963_v48 = vld [vmem:[#allocation3 + $0x7b0] sm:$0xff] }
 0x223   :  { %v1804_v56 = vadd.f32 %v1803_v55, %v1378_v54  ;;  %1621 = vmatprep.mubr.f32.mxu1 %v938_v52  ;;  %2326 = vmatprep.mubr.msk.f32.mxu0 %vm1065_vm2, %v940_v53  ;;  %v968_v52 = vld [vmem:[#allocation3 + $0x7d8] sm:$0xff] }
 0x224   :  { %v1380_v59 = vpop.f32.mrf.mxu1  ;;  %v1805_v60 = vpop.f32.mrf.mxu0 }
 0x225   :  { %2138 = vst.msk [vmem:[%s3320_s3 + $0x30] sm:$0xff] %vm656_vm3, %v1804_v56  ;;  %v965_v56 = vld [vmem:[#allocation3 + $0x7c0] sm:$0xff]  ;;  %v970_v60 = vld [vmem:[#allocation3 + $0x7e8] sm:$0xff] }
 0x226   :  { %v1383_v63 = vpop.f32.mrf.mxu1  ;;  %1622 = vmatmul.mubr.f32.gmra.mxu1 %v937_v57  ;;  %v1808_v1 = vpop.f32.mrf.mxu0  ;;  %2047 = vmatmul.mubr.f32.gmra.mxu0 %v939_v58  ;;  %v967_v57 = vld [vmem:[#allocation3 + $0x7d0] sm:$0xff] }
 0x227   :  { %v1809_v2 = vadd.f32 %v1808_v1, %v1383_v63  ;;  %1626 = vmatprep.mubr.f32.mxu1 %v942_v61  ;;  %2327 = vmatprep.mubr.msk.f32.mxu0 %vm1065_vm2, %v944_v62  ;;  %v972_v61 = vld [vmem:[#allocation3 + $0x7f8] sm:$0xff] }
 0x228   :  { %v1385_v0 = vpop.f32.mrf.mxu1  ;;  %v1810_v5 = vpop.f32.mrf.mxu0 }
 0x229   :  { %2139 = vst.msk [vmem:[%s3320_s3 + $0x38] sm:$0xff] %vm656_vm3, %v1809_v2  ;;  %v969_v2 = vld [vmem:[#allocation3 + $0x7e0] sm:$0xff]  ;;  %v974_v5 = vld [vmem:[#allocation3 + $0x808] sm:$0xff] }
 0x22a   :  { %v1388_v8 = vpop.f32.mrf.mxu1  ;;  %1627 = vmatmul.mubr.f32.gmra.mxu1 %v941_v3  ;;  %v1813_v9 = vpop.f32.mrf.mxu0  ;;  %2052 = vmatmul.mubr.f32.gmra.mxu0 %v943_v4  ;;  %v971_v3 = vld [vmem:[#allocation3 + $0x7f0] sm:$0xff] }
 0x22b   :  { %v1814_v10 = vadd.f32 %v1813_v9, %v1388_v8  ;;  %1631 = vmatprep.mubr.f32.mxu1 %v946_v6  ;;  %2328 = vmatprep.mubr.msk.f32.mxu0 %vm1065_vm2, %v948_v7  ;;  %v976_v6 = vld [vmem:[#allocation3 + $0x818] sm:$0xff] }
 0x22c   :  { %v1390_v13 = vpop.f32.mrf.mxu1  ;;  %v1815_v14 = vpop.f32.mrf.mxu0 }
 0x22d   :  { %2140 = vst.msk [vmem:[%s3320_s3 + $0x40] sm:$0xff] %vm656_vm3, %v1814_v10  ;;  %v973_v10 = vld [vmem:[#allocation3 + $0x800] sm:$0xff]  ;;  %v978_v14 = vld [vmem:[#allocation3 + $0x828] sm:$0xff] }
 0x22e   :  { %v1393_v17 = vpop.f32.mrf.mxu1  ;;  %1632 = vmatmul.mubr.f32.gmra.mxu1 %v945_v11  ;;  %v1818_v18 = vpop.f32.mrf.mxu0  ;;  %2057 = vmatmul.mubr.f32.gmra.mxu0 %v947_v12  ;;  %v975_v11 = vld [vmem:[#allocation3 + $0x810] sm:$0xff] }
 0x22f   :  { %v1819_v19 = vadd.f32 %v1818_v18, %v1393_v17  ;;  %1636 = vmatprep.mubr.f32.mxu1 %v950_v15  ;;  %2329 = vmatprep.mubr.msk.f32.mxu0 %vm1065_vm2, %v952_v16  ;;  %v980_v15 = vld [vmem:[#allocation3 + $0x838] sm:$0xff] }
 0x230   :  { %v1395_v22 = vpop.f32.mrf.mxu1  ;;  %v1820_v23 = vpop.f32.mrf.mxu0 }
 0x231   :  { %2141 = vst.msk [vmem:[%s3320_s3 + $0x48] sm:$0xff] %vm656_vm3, %v1819_v19  ;;  %v977_v19 = vld [vmem:[#allocation3 + $0x820] sm:$0xff]  ;;  %v982_v23 = vld [vmem:[#allocation3 + $0x848] sm:$0xff] }
 0x232   :  { %v1398_v26 = vpop.f32.mrf.mxu1  ;;  %1637 = vmatmul.mubr.f32.gmra.mxu1 %v949_v20  ;;  %v1823_v27 = vpop.f32.mrf.mxu0  ;;  %2062 = vmatmul.mubr.f32.gmra.mxu0 %v951_v21  ;;  %v979_v20 = vld [vmem:[#allocation3 + $0x830] sm:$0xff] }
 0x233   :  { %v1824_v28 = vadd.f32 %v1823_v27, %v1398_v26  ;;  %1641 = vmatprep.mubr.f32.mxu1 %v954_v24  ;;  %2330 = vmatprep.mubr.msk.f32.mxu0 %vm1065_vm2, %v956_v25  ;;  %v984_v24 = vld [vmem:[#allocation3 + $0x858] sm:$0xff] }
 0x234   :  { %v1400_v31 = vpop.f32.mrf.mxu1  ;;  %v1825_v32 = vpop.f32.mrf.mxu0 }
 0x235   :  { %2142 = vst.msk [vmem:[%s3320_s3 + $0x50] sm:$0xff] %vm656_vm3, %v1824_v28  ;;  %v981_v28 = vld [vmem:[#allocation3 + $0x840] sm:$0xff]  ;;  %v986_v32 = vld [vmem:[#allocation3 + $0x868] sm:$0xff] }
 0x236   :  { %v1403_v35 = vpop.f32.mrf.mxu1  ;;  %1642 = vmatmul.mubr.f32.gmra.mxu1 %v953_v29  ;;  %v1828_v36 = vpop.f32.mrf.mxu0  ;;  %2067 = vmatmul.mubr.f32.gmra.mxu0 %v955_v30  ;;  %v983_v29 = vld [vmem:[#allocation3 + $0x850] sm:$0xff] }
 0x237   :  { %v1829_v37 = vadd.f32 %v1828_v36, %v1403_v35  ;;  %1646 = vmatprep.mubr.f32.mxu1 %v958_v33  ;;  %2331 = vmatprep.mubr.msk.f32.mxu0 %vm1065_vm2, %v960_v34  ;;  %v988_v33 = vld [vmem:[#allocation3 + $0x878] sm:$0xff] }
 0x238   :  { %v1405_v40 = vpop.f32.mrf.mxu1  ;;  %v1830_v41 = vpop.f32.mrf.mxu0 }
 0x239   :  { %2143 = vst.msk [vmem:[%s3320_s3 + $0x58] sm:$0xff] %vm656_vm3, %v1829_v37  ;;  %v985_v37 = vld [vmem:[#allocation3 + $0x860] sm:$0xff]  ;;  %v990_v41 = vld [vmem:[#allocation3 + $0x888] sm:$0xff] }
 0x23a   :  { %v1408_v44 = vpop.f32.mrf.mxu1  ;;  %1647 = vmatmul.mubr.f32.gmra.mxu1 %v957_v38  ;;  %v1833_v45 = vpop.f32.mrf.mxu0  ;;  %2072 = vmatmul.mubr.f32.gmra.mxu0 %v959_v39  ;;  %v987_v38 = vld [vmem:[#allocation3 + $0x870] sm:$0xff] }
 0x23b   :  { %v1834_v46 = vadd.f32 %v1833_v45, %v1408_v44  ;;  %1651 = vmatprep.mubr.f32.mxu1 %v962_v42  ;;  %2332 = vmatprep.mubr.msk.f32.mxu0 %vm1065_vm2, %v964_v43  ;;  %v992_v42 = vld [vmem:[#allocation3 + $0x898] sm:$0xff] }
 0x23c   :  { %v1410_v49 = vpop.f32.mrf.mxu1  ;;  %v1835_v50 = vpop.f32.mrf.mxu0 }
 0x23d   :  { %2144 = vst.msk [vmem:[%s3320_s3 + $0x60] sm:$0xff] %vm656_vm3, %v1834_v46  ;;  %v989_v46 = vld [vmem:[#allocation3 + $0x880] sm:$0xff]  ;;  %v994_v50 = vld [vmem:[#allocation3 + $0x8a8] sm:$0xff] }
 0x23e   :  { %v1413_v53 = vpop.f32.mrf.mxu1  ;;  %1652 = vmatmul.mubr.f32.gmra.mxu1 %v961_v47  ;;  %v1838_v54 = vpop.f32.mrf.mxu0  ;;  %2077 = vmatmul.mubr.f32.gmra.mxu0 %v963_v48  ;;  %v991_v47 = vld [vmem:[#allocation3 + $0x890] sm:$0xff] }
 0x23f   :  { %v1839_v55 = vadd.f32 %v1838_v54, %v1413_v53  ;;  %1656 = vmatprep.mubr.f32.mxu1 %v966_v51  ;;  %2333 = vmatprep.mubr.msk.f32.mxu0 %vm1065_vm2, %v968_v52  ;;  %v996_v51 = vld [vmem:[#allocation3 + $0x8b8] sm:$0xff] }
 0x240   :  { %v1415_v58 = vpop.f32.mrf.mxu1  ;;  %v1840_v59 = vpop.f32.mrf.mxu0 }
 0x241   :  { %2145 = vst.msk [vmem:[%s3320_s3 + $0x68] sm:$0xff] %vm656_vm3, %v1839_v55  ;;  %v993_v55 = vld [vmem:[#allocation3 + $0x8a0] sm:$0xff]  ;;  %v998_v59 = vld [vmem:[#allocation3 + $0x8c8] sm:$0xff] }
 0x242   :  { %v1418_v62 = vpop.f32.mrf.mxu1  ;;  %1657 = vmatmul.mubr.f32.gmra.mxu1 %v965_v56  ;;  %v1843_v63 = vpop.f32.mrf.mxu0  ;;  %2082 = vmatmul.mubr.f32.gmra.mxu0 %v967_v57  ;;  %v995_v56 = vld [vmem:[#allocation3 + $0x8b0] sm:$0xff] }
 0x243   :  { %v1844_v1 = vadd.f32 %v1843_v63, %v1418_v62  ;;  %1661 = vmatprep.mubr.f32.mxu1 %v970_v60  ;;  %2334 = vmatprep.mubr.msk.f32.mxu0 %vm1065_vm2, %v972_v61  ;;  %v1000_v60 = vld [vmem:[#allocation3 + $0x8d8] sm:$0xff] }
 0x244   :  { %v1420_v4 = vpop.f32.mrf.mxu1  ;;  %v1845_v0 = vpop.f32.mrf.mxu0 }
 0x245   :  { %2146 = vst.msk [vmem:[%s3320_s3 + $0x70] sm:$0xff] %vm656_vm3, %v1844_v1  ;;  %v997_v1 = vld [vmem:[#allocation3 + $0x8c0] sm:$0xff]  ;;  %v1002_v0 = vld [vmem:[#allocation3 + $0x8e8] sm:$0xff] }
 0x246   :  { %v1423_v7 = vpop.f32.mrf.mxu1  ;;  %1662 = vmatmul.mubr.f32.gmra.mxu1 %v969_v2  ;;  %v1848_v8 = vpop.f32.mrf.mxu0  ;;  %2087 = vmatmul.mubr.f32.gmra.mxu0 %v971_v3  ;;  %v999_v2 = vld [vmem:[#allocation3 + $0x8d0] sm:$0xff] }
 0x247   :  { %v1849_v9 = vadd.f32 %v1848_v8, %v1423_v7  ;;  %1666 = vmatprep.mubr.f32.mxu1 %v974_v5  ;;  %2335 = vmatprep.mubr.msk.f32.mxu0 %vm1065_vm2, %v976_v6  ;;  %v1004_v5 = vld [vmem:[#allocation3 + $0x8f8] sm:$0xff] }
 0x248   :  { %v1425_v12 = vpop.f32.mrf.mxu1  ;;  %v1850_v13 = vpop.f32.mrf.mxu0 }
 0x249   :  { %2147 = vst.msk [vmem:[%s3320_s3 + $0x78] sm:$0xff] %vm656_vm3, %v1849_v9  ;;  %v1001_v9 = vld [vmem:[#allocation3 + $0x8e0] sm:$0xff] }
 0x24a   :  { %v1428_v16 = vpop.f32.mrf.mxu1  ;;  %1667 = vmatmul.mubr.f32.gmra.mxu1 %v973_v10  ;;  %v1853_v17 = vpop.f32.mrf.mxu0  ;;  %2092 = vmatmul.mubr.f32.gmra.mxu0 %v975_v11  ;;  %v1003_v10 = vld [vmem:[#allocation3 + $0x8f0] sm:$0xff] }
 0x24b   :  { %v1854_v18 = vadd.f32 %v1853_v17, %v1428_v16  ;;  %1671 = vmatprep.mubr.f32.mxu1 %v978_v14  ;;  %2336 = vmatprep.mubr.msk.f32.mxu0 %vm1065_vm2, %v980_v15 }
 0x24c   :  { %v1430_v21 = vpop.f32.mrf.mxu1  ;;  %v1855_v22 = vpop.f32.mrf.mxu0 }
 0x24d   :  { %2148 = vst.msk [vmem:[%s3320_s3 + $0x80] sm:$0xff] %vm656_vm3, %v1854_v18 }
 0x24e   :  { %v1433_v25 = vpop.f32.mrf.mxu1  ;;  %1672 = vmatmul.mubr.f32.gmra.mxu1 %v977_v19  ;;  %v1858_v26 = vpop.f32.mrf.mxu0  ;;  %2097 = vmatmul.mubr.f32.gmra.mxu0 %v979_v20 }
 0x24f   :  { %v1859_v27 = vadd.f32 %v1858_v26, %v1433_v25  ;;  %1676 = vmatprep.mubr.f32.mxu1 %v982_v23  ;;  %2337 = vmatprep.mubr.msk.f32.mxu0 %vm1065_vm2, %v984_v24 }
 0x250   :  { %v1435_v30 = vpop.f32.mrf.mxu1  ;;  %v1860_v31 = vpop.f32.mrf.mxu0 }
 0x251   :  { %2149 = vst.msk [vmem:[%s3320_s3 + $0x88] sm:$0xff] %vm656_vm3, %v1859_v27 }
 0x252   :  { %v1438_v34 = vpop.f32.mrf.mxu1  ;;  %1677 = vmatmul.mubr.f32.gmra.mxu1 %v981_v28  ;;  %v1863_v35 = vpop.f32.mrf.mxu0  ;;  %2102 = vmatmul.mubr.f32.gmra.mxu0 %v983_v29 }
 0x253   :  { %v1864_v36 = vadd.f32 %v1863_v35, %v1438_v34  ;;  %1681 = vmatprep.mubr.f32.mxu1 %v986_v32  ;;  %2338 = vmatprep.mubr.msk.f32.mxu0 %vm1065_vm2, %v988_v33 }
 0x254   :  { %v1440_v39 = vpop.f32.mrf.mxu1  ;;  %v1865_v40 = vpop.f32.mrf.mxu0 }
 0x255   :  { %2150 = vst.msk [vmem:[%s3320_s3 + $0x90] sm:$0xff] %vm656_vm3, %v1864_v36 }
 0x256   :  { %v1443_v43 = vpop.f32.mrf.mxu1  ;;  %1682 = vmatmul.mubr.f32.gmra.mxu1 %v985_v37  ;;  %v1868_v44 = vpop.f32.mrf.mxu0  ;;  %2107 = vmatmul.mubr.f32.gmra.mxu0 %v987_v38 }
 0x257   :  { %v1869_v45 = vadd.f32 %v1868_v44, %v1443_v43  ;;  %1686 = vmatprep.mubr.f32.mxu1 %v990_v41  ;;  %2339 = vmatprep.mubr.msk.f32.mxu0 %vm1065_vm2, %v992_v42 }
 0x258   :  { %v1445_v48 = vpop.f32.mrf.mxu1  ;;  %v1870_v49 = vpop.f32.mrf.mxu0 }
 0x259   :  { %2151 = vst.msk [vmem:[%s3320_s3 + $0x98] sm:$0xff] %vm656_vm3, %v1869_v45 }
 0x25a   :  { %v1448_v52 = vpop.f32.mrf.mxu1  ;;  %1687 = vmatmul.mubr.f32.gmra.mxu1 %v989_v46  ;;  %v1873_v53 = vpop.f32.mrf.mxu0  ;;  %2112 = vmatmul.mubr.f32.gmra.mxu0 %v991_v47 }
 0x25b   :  { %v1874_v54 = vadd.f32 %v1873_v53, %v1448_v52  ;;  %1691 = vmatprep.mubr.f32.mxu1 %v994_v50  ;;  %2340 = vmatprep.mubr.msk.f32.mxu0 %vm1065_vm2, %v996_v51 }
 0x25c   :  { %v1450_v57 = vpop.f32.mrf.mxu1  ;;  %v1875_v58 = vpop.f32.mrf.mxu0 }
 0x25d   :  { %2152 = vst.msk [vmem:[%s3320_s3 + $0xa0] sm:$0xff] %vm656_vm3, %v1874_v54 }
 0x25e   :  { %v1453_v61 = vpop.f32.mrf.mxu1  ;;  %1692 = vmatmul.mubr.f32.gmra.mxu1 %v993_v55  ;;  %v1878_v62 = vpop.f32.mrf.mxu0  ;;  %2117 = vmatmul.mubr.f32.gmra.mxu0 %v995_v56 }
 0x25f   :  { %v1879_v63 = vadd.f32 %v1878_v62, %v1453_v61  ;;  %1696 = vmatprep.mubr.f32.mxu1 %v998_v59  ;;  %2341 = vmatprep.mubr.msk.f32.mxu0 %vm1065_vm2, %v1000_v60 }
 0x260   :  { %v1455_v3 = vpop.f32.mrf.mxu1  ;;  %v1880_v4 = vpop.f32.mrf.mxu0 }
 0x261   :  { %2153 = vst.msk [vmem:[%s3320_s3 + $0xa8] sm:$0xff] %vm656_vm3, %v1879_v63 }
 0x262   :  { %v1458_v6 = vpop.f32.mrf.mxu1  ;;  %1697 = vmatmul.mubr.f32.gmra.mxu1 %v997_v1  ;;  %v1883_v7 = vpop.f32.mrf.mxu0  ;;  %2122 = vmatmul.mubr.f32.gmra.mxu0 %v999_v2 }
 0x263   :  { %v1884_v8 = vadd.f32 %v1883_v7, %v1458_v6  ;;  %1701 = vmatprep.mubr.f32.mxu1 %v1002_v0  ;;  %2342 = vmatprep.mubr.msk.f32.mxu0 %vm1065_vm2, %v1004_v5 }
 0x264   :  { %v1460_v11 = vpop.f32.mrf.mxu1  ;;  %v1885_v12 = vpop.f32.mrf.mxu0 }
 0x265   :  { %2154 = vst.msk [vmem:[%s3320_s3 + $0xb0] sm:$0xff] %vm656_vm3, %v1884_v8 }
 0x266   :  { %v1463_v13 = vpop.f32.mrf.mxu1  ;;  %1702 = vmatmul.mubr.f32.gmra.mxu1 %v1001_v9  ;;  %v1888_v14 = vpop.f32.mrf.mxu0  ;;  %2127 = vmatmul.mubr.f32.gmra.mxu0 %v1003_v10 }
 0x267   :  { %v1889_v15 = vadd.f32 %v1888_v14, %v1463_v13 }
 0x268   :  { %v1465_v16 = vpop.f32.mrf.mxu1  ;;  %v1890_v17 = vpop.f32.mrf.mxu0 }
 0x269   :  { %2155 = vst.msk [vmem:[%s3320_s3 + $0xb8] sm:$0xff] %vm656_vm3, %v1889_v15 }
 0x26a   :  { %v1468_v18 = vpop.f32.mrf.mxu1  ;;  %v1893_v19 = vpop.f32.mrf.mxu0 }
 0x26b   :  { %v1894_v20 = vadd.f32 %v1893_v19, %v1468_v18 }
 0x26c   :  { %v1470_v21 = vpop.f32.mrf.mxu1  ;;  %v1895_v22 = vpop.f32.mrf.mxu0 }
 0x26d   :  { %2156 = vst.msk [vmem:[%s3320_s3 + $0xc0] sm:$0xff] %vm656_vm3, %v1894_v20 }
 0x26e   :  { %v1473_v23 = vpop.f32.mrf.mxu1  ;;  %v1898_v24 = vpop.f32.mrf.mxu0 }
 0x26f   :  { %v1899_v25 = vadd.f32 %v1898_v24, %v1473_v23 }
 0x270   :  { %v1475_v26 = vpop.f32.mrf.mxu1  ;;  %v1900_v27 = vpop.f32.mrf.mxu0 }
 0x271   :  { %2157 = vst.msk [vmem:[%s3320_s3 + $0xc8] sm:$0xff] %vm656_vm3, %v1899_v25 }
 0x272   :  { %v1478_v28 = vpop.f32.mrf.mxu1  ;;  %v1903_v29 = vpop.f32.mrf.mxu0 }
 0x273   :  { %v1904_v30 = vadd.f32 %v1903_v29, %v1478_v28 }
 0x274   :  { %v1480_v31 = vpop.f32.mrf.mxu1  ;;  %v1905_v32 = vpop.f32.mrf.mxu0 }
 0x275   :  { %2158 = vst.msk [vmem:[%s3320_s3 + $0xd0] sm:$0xff] %vm656_vm3, %v1904_v30 }
 0x276   :  { %v1483_v33 = vpop.f32.mrf.mxu1  ;;  %v1908_v34 = vpop.f32.mrf.mxu0 }
 0x277   :  { %v1909_v35 = vadd.f32 %v1908_v34, %v1483_v33 }
 0x278   :  { %v1485_v36 = vpop.f32.mrf.mxu1  ;;  %v1910_v37 = vpop.f32.mrf.mxu0 }
 0x279   :  { %2159 = vst.msk [vmem:[%s3320_s3 + $0xd8] sm:$0xff] %vm656_vm3, %v1909_v35 }
 0x27a   :  { %v1488_v38 = vpop.f32.mrf.mxu1  ;;  %v1913_v39 = vpop.f32.mrf.mxu0 }
 0x27b   :  { %v1914_v40 = vadd.f32 %v1913_v39, %v1488_v38 }
 0x27c   :  { %v1490_v41 = vpop.f32.mrf.mxu1  ;;  %v1915_v42 = vpop.f32.mrf.mxu0 }
 0x27d   :  { %2160 = vst.msk [vmem:[%s3320_s3 + $0xe0] sm:$0xff] %vm656_vm3, %v1914_v40 }
 0x27e   :  { %v1493_v43 = vpop.f32.mrf.mxu1  ;;  %v1918_v44 = vpop.f32.mrf.mxu0 }
 0x27f   :  { %v1919_v45 = vadd.f32 %v1918_v44, %v1493_v43 }
 0x280   :  { %v1495_v46 = vpop.f32.mrf.mxu1  ;;  %v1920_v47 = vpop.f32.mrf.mxu0 }
 0x281   :  { %2161 = vst.msk [vmem:[%s3320_s3 + $0xe8] sm:$0xff] %vm656_vm3, %v1919_v45 }
 0x282   :  { %v1498_v48 = vpop.f32.mrf.mxu1  ;;  %v1923_v49 = vpop.f32.mrf.mxu0 }
 0x283   :  { %v1924_v50 = vadd.f32 %v1923_v49, %v1498_v48 }
 0x284   :  { %v1500_v51 = vpop.f32.mrf.mxu1  ;;  %v1925_v52 = vpop.f32.mrf.mxu0 }
 0x285   :  { %2162 = vst.msk [vmem:[%s3320_s3 + $0xf0] sm:$0xff] %vm656_vm3, %v1924_v50 }
 0x286   :  { %v1503_v53 = vpop.f32.mrf.mxu1  ;;  %v1928_v54 = vpop.f32.mrf.mxu0 }
 0x287   :  { %v1929_v55 = vadd.f32 %v1928_v54, %v1503_v53 }
 0x288   :  { %v1505_v56 = vpop.f32.mrf.mxu1  ;;  %v1930_v57 = vpop.f32.mrf.mxu0 }
 0x289   :  { %2163 = vst.msk [vmem:[%s3320_s3 + $0xf8] sm:$0xff] %vm656_vm3, %v1929_v55 }
 0x28a   :  { %v1508_v58 = vpop.f32.mrf.mxu1  ;;  %v1933_v59 = vpop.f32.mrf.mxu0 }
 0x28b   :  { %v1934_v60 = vadd.f32 %v1933_v59, %v1508_v58 }
 0x28c   :  { %v1510_v61 = vpop.f32.mrf.mxu1  ;;  %v1935_v62 = vpop.f32.mrf.mxu0 }
 0x28d   :  { %2164 = vst.msk [vmem:[%s3320_s3 + $0x100] sm:$0xff] %vm656_vm3, %v1934_v60 }
 0x28e   :  { %v1513_v63 = vpop.f32.mrf.mxu1  ;;  %v1938_v1 = vpop.f32.mrf.mxu0 }
 0x28f   :  { %v1939_v2 = vadd.f32 %v1938_v1, %v1513_v63 }
 0x290   :  { %v1515_v3 = vpop.f32.mrf.mxu1  ;;  %v1940_v4 = vpop.f32.mrf.mxu0 }
 0x291   :  { %2165 = vst.msk [vmem:[%s3320_s3 + $0x108] sm:$0xff] %vm656_vm3, %v1939_v2 }
 0x292   :  { %v1518_v0 = vpop.f32.mrf.mxu1  ;;  %v1943_v5 = vpop.f32.mrf.mxu0 }
 0x293   :  { %v1944_v6 = vadd.f32 %v1943_v5, %v1518_v0 }
 0x294   :  { %v1520_v7 = vpop.f32.mrf.mxu1  ;;  %v1945_v8 = vpop.f32.mrf.mxu0 }
 0x295   :  { %2166 = vst.msk [vmem:[%s3320_s3 + $0x110] sm:$0xff] %vm656_vm3, %v1944_v6 }
 0x296   :  { %v1523_v9 = vpop.f32.mrf.mxu1  ;;  %v1948_v10 = vpop.f32.mrf.mxu0 }
 0x297   :  { %v1949_v11 = vadd.f32 %v1948_v10, %v1523_v9 }
 0x298   :  { %v1525_v12 = vpop.f32.mrf.mxu1  ;;  %v1950_v13 = vpop.f32.mrf.mxu0 }
 0x299   :  { %2167 = vst.msk [vmem:[%s3320_s3 + $0x118] sm:$0xff] %vm656_vm3, %v1949_v11 }
 0x29a   :  { %v1528_v14 = vpop.f32.mrf.mxu1  ;;  %v1953_v15 = vpop.f32.mrf.mxu0 }
 0x29b   :  { %v1954_v16 = vadd.f32 %v1953_v15, %v1528_v14 }
 0x29c   :  { %v1530_v17 = vpop.f32.mrf.mxu1  ;;  %v1955_v18 = vpop.f32.mrf.mxu0 }
 0x29d   :  { %2168 = vst.msk [vmem:[%s3320_s3 + $0x120] sm:$0xff] %vm656_vm3, %v1954_v16 }
 0x29e   :  { %v1533_v19 = vpop.f32.mrf.mxu1  ;;  %v1958_v20 = vpop.f32.mrf.mxu0 }
 0x29f   :  { %v1959_v21 = vadd.f32 %v1958_v20, %v1533_v19 }
 0x2a0   :  { %v1535_v22 = vpop.f32.mrf.mxu1  ;;  %v1960_v23 = vpop.f32.mrf.mxu0 }
 0x2a1   :  { %2169 = vst.msk [vmem:[%s3320_s3 + $0x128] sm:$0xff] %vm656_vm3, %v1959_v21 }
 0x2a2   :  { %v1538_v24 = vpop.f32.mrf.mxu1  ;;  %v1963_v25 = vpop.f32.mrf.mxu0 }
 0x2a3   :  { %v1964_v26 = vadd.f32 %v1963_v25, %v1538_v24 }
 0x2a4   :  { %v1540_v27 = vpop.f32.mrf.mxu1  ;;  %v1965_v28 = vpop.f32.mrf.mxu0 }
 0x2a5   :  { %2170 = vst.msk [vmem:[%s3320_s3 + $0x130] sm:$0xff] %vm656_vm3, %v1964_v26 }
 0x2a6   :  { %v1543_v29 = vpop.f32.mrf.mxu1  ;;  %v1968_v30 = vpop.f32.mrf.mxu0 }
 0x2a7   :  { %v1969_v31 = vadd.f32 %v1968_v30, %v1543_v29 }
 0x2a8   :  { %v1545_v32 = vpop.f32.mrf.mxu1  ;;  %v1970_v33 = vpop.f32.mrf.mxu0 }
 0x2a9   :  { %2171 = vst.msk [vmem:[%s3320_s3 + $0x138] sm:$0xff] %vm656_vm3, %v1969_v31 }
 0x2aa   :  { %v1548_v34 = vpop.f32.mrf.mxu1  ;;  %v1973_v35 = vpop.f32.mrf.mxu0 }
 0x2ab   :  { %v1974_v36 = vadd.f32 %v1973_v35, %v1548_v34 }
 0x2ac   :  { %v1550_v37 = vpop.f32.mrf.mxu1  ;;  %v1975_v38 = vpop.f32.mrf.mxu0 }
 0x2ad   :  { %2172 = vst.msk [vmem:[%s3320_s3 + $0x140] sm:$0xff] %vm656_vm3, %v1974_v36 }
 0x2ae   :  { %v1553_v39 = vpop.f32.mrf.mxu1  ;;  %v1978_v40 = vpop.f32.mrf.mxu0 }
 0x2af   :  { %v1979_v41 = vadd.f32 %v1978_v40, %v1553_v39 }
 0x2b0   :  { %v1555_v42 = vpop.f32.mrf.mxu1  ;;  %v1980_v43 = vpop.f32.mrf.mxu0 }
 0x2b1   :  { %2173 = vst.msk [vmem:[%s3320_s3 + $0x148] sm:$0xff] %vm656_vm3, %v1979_v41 }
 0x2b2   :  { %v1558_v44 = vpop.f32.mrf.mxu1  ;;  %v1983_v45 = vpop.f32.mrf.mxu0 }
 0x2b3   :  { %v1984_v46 = vadd.f32 %v1983_v45, %v1558_v44 }
 0x2b4   :  { %v1560_v47 = vpop.f32.mrf.mxu1  ;;  %v1985_v48 = vpop.f32.mrf.mxu0 }
 0x2b5   :  { %2174 = vst.msk [vmem:[%s3320_s3 + $0x150] sm:$0xff] %vm656_vm3, %v1984_v46 }
 0x2b6   :  { %v1563_v49 = vpop.f32.mrf.mxu1  ;;  %v1988_v50 = vpop.f32.mrf.mxu0 }
 0x2b7   :  { %v1989_v51 = vadd.f32 %v1988_v50, %v1563_v49 }
 0x2b8   :  { %v1565_v52 = vpop.f32.mrf.mxu1  ;;  %v1990_v53 = vpop.f32.mrf.mxu0 }
 0x2b9   :  { %2175 = vst.msk [vmem:[%s3320_s3 + $0x158] sm:$0xff] %vm656_vm3, %v1989_v51 }
 0x2ba   :  { %v1568_v54 = vpop.f32.mrf.mxu1  ;;  %v1993_v55 = vpop.f32.mrf.mxu0 }
 0x2bb   :  { %v1994_v56 = vadd.f32 %v1993_v55, %v1568_v54 }
 0x2bc   :  { %v1570_v57 = vpop.f32.mrf.mxu1  ;;  %v1995_v58 = vpop.f32.mrf.mxu0 }
 0x2bd   :  { %2176 = vst.msk [vmem:[%s3320_s3 + $0x160] sm:$0xff] %vm656_vm3, %v1994_v56 }
 0x2be   :  { %v1573_v59 = vpop.f32.mrf.mxu1  ;;  %v1998_v60 = vpop.f32.mrf.mxu0 }
 0x2bf   :  { %v1999_v61 = vadd.f32 %v1998_v60, %v1573_v59 }
 0x2c0   :  { %v1575_v62 = vpop.f32.mrf.mxu1  ;;  %v2000_v63 = vpop.f32.mrf.mxu0 }
 0x2c1   :  { %2177 = vst.msk [vmem:[%s3320_s3 + $0x168] sm:$0xff] %vm656_vm3, %v1999_v61 }
 0x2c2   :  { %v1578_v1 = vpop.f32.mrf.mxu1  ;;  %v2003_v2 = vpop.f32.mrf.mxu0 }
 0x2c3   :  { %v2004_v3 = vadd.f32 %v2003_v2, %v1578_v1 }
 0x2c4   :  { %v1580_v4 = vpop.f32.mrf.mxu1  ;;  %v2005_v0 = vpop.f32.mrf.mxu0 }
 0x2c5   :  { %2178 = vst.msk [vmem:[%s3320_s3 + $0x170] sm:$0xff] %vm656_vm3, %v2004_v3 }
 0x2c6   :  { %v1583_v5 = vpop.f32.mrf.mxu1  ;;  %v2008_v6 = vpop.f32.mrf.mxu0 }
 0x2c7   :  { %v2009_v7 = vadd.f32 %v2008_v6, %v1583_v5 }
 0x2c8   :  { %v1585_v8 = vpop.f32.mrf.mxu1  ;;  %v2010_v9 = vpop.f32.mrf.mxu0 }
 0x2c9   :  { %2179 = vst.msk [vmem:[%s3320_s3 + $0x178] sm:$0xff] %vm656_vm3, %v2009_v7 }
 0x2ca   :  { %v1588_v10 = vpop.f32.mrf.mxu1  ;;  %v2013_v11 = vpop.f32.mrf.mxu0 }
 0x2cb   :  { %v2014_v12 = vadd.f32 %v2013_v11, %v1588_v10 }
 0x2cc   :  { %v1590_v13 = vpop.f32.mrf.mxu1  ;;  %v2015_v14 = vpop.f32.mrf.mxu0 }
 0x2cd   :  { %2180 = vst.msk [vmem:[%s3320_s3 + $0x180] sm:$0xff] %vm656_vm3, %v2014_v12 }
 0x2ce   :  { %v1593_v15 = vpop.f32.mrf.mxu1  ;;  %v2018_v16 = vpop.f32.mrf.mxu0 }
 0x2cf   :  { %v2019_v17 = vadd.f32 %v2018_v16, %v1593_v15 }
 0x2d0   :  { %v1595_v18 = vpop.f32.mrf.mxu1  ;;  %v2020_v19 = vpop.f32.mrf.mxu0 }
 0x2d1   :  { %2181 = vst.msk [vmem:[%s3320_s3 + $0x188] sm:$0xff] %vm656_vm3, %v2019_v17 }
 0x2d2   :  { %v1598_v20 = vpop.f32.mrf.mxu1  ;;  %v2023_v21 = vpop.f32.mrf.mxu0 }
 0x2d3   :  { %v2024_v22 = vadd.f32 %v2023_v21, %v1598_v20 }
 0x2d4   :  { %v1600_v23 = vpop.f32.mrf.mxu1  ;;  %v2025_v24 = vpop.f32.mrf.mxu0 }
 0x2d5   :  { %2182 = vst.msk [vmem:[%s3320_s3 + $0x190] sm:$0xff] %vm656_vm3, %v2024_v22 }
 0x2d6   :  { %v1603_v25 = vpop.f32.mrf.mxu1  ;;  %v2028_v26 = vpop.f32.mrf.mxu0 }
 0x2d7   :  { %v2029_v27 = vadd.f32 %v2028_v26, %v1603_v25 }
 0x2d8   :  { %v1605_v28 = vpop.f32.mrf.mxu1  ;;  %v2030_v29 = vpop.f32.mrf.mxu0 }
 0x2d9   :  { %2183 = vst.msk [vmem:[%s3320_s3 + $0x198] sm:$0xff] %vm656_vm3, %v2029_v27 }
 0x2da   :  { %v1608_v30 = vpop.f32.mrf.mxu1  ;;  %v2033_v31 = vpop.f32.mrf.mxu0 }
 0x2db   :  { %v2034_v32 = vadd.f32 %v2033_v31, %v1608_v30 }
 0x2dc   :  { %v1610_v33 = vpop.f32.mrf.mxu1  ;;  %v2035_v34 = vpop.f32.mrf.mxu0 }
 0x2dd   :  { %2184 = vst.msk [vmem:[%s3320_s3 + $0x1a0] sm:$0xff] %vm656_vm3, %v2034_v32 }
 0x2de   :  { %v1613_v35 = vpop.f32.mrf.mxu1  ;;  %v2038_v36 = vpop.f32.mrf.mxu0 }
 0x2df   :  { %v2039_v37 = vadd.f32 %v2038_v36, %v1613_v35 }
 0x2e0   :  { %v1615_v38 = vpop.f32.mrf.mxu1  ;;  %v2040_v39 = vpop.f32.mrf.mxu0 }
 0x2e1   :  { %2185 = vst.msk [vmem:[%s3320_s3 + $0x1a8] sm:$0xff] %vm656_vm3, %v2039_v37 }
 0x2e2   :  { %v1618_v40 = vpop.f32.mrf.mxu1  ;;  %v2043_v41 = vpop.f32.mrf.mxu0 }
 0x2e3   :  { %v2044_v42 = vadd.f32 %v2043_v41, %v1618_v40 }
 0x2e4   :  { %v1620_v43 = vpop.f32.mrf.mxu1  ;;  %v2045_v44 = vpop.f32.mrf.mxu0 }
 0x2e5   :  { %2186 = vst.msk [vmem:[%s3320_s3 + $0x1b0] sm:$0xff] %vm656_vm3, %v2044_v42 }
 0x2e6   :  { %v1623_v45 = vpop.f32.mrf.mxu1  ;;  %v2048_v46 = vpop.f32.mrf.mxu0 }
 0x2e7   :  { %v2049_v47 = vadd.f32 %v2048_v46, %v1623_v45 }
 0x2e8   :  { %v1625_v48 = vpop.f32.mrf.mxu1  ;;  %v2050_v49 = vpop.f32.mrf.mxu0 }
 0x2e9   :  { %2187 = vst.msk [vmem:[%s3320_s3 + $0x1b8] sm:$0xff] %vm656_vm3, %v2049_v47 }
 0x2ea   :  { %v1628_v50 = vpop.f32.mrf.mxu1  ;;  %v2053_v51 = vpop.f32.mrf.mxu0 }
 0x2eb   :  { %v2054_v52 = vadd.f32 %v2053_v51, %v1628_v50 }
 0x2ec   :  { %v1630_v53 = vpop.f32.mrf.mxu1  ;;  %v2055_v54 = vpop.f32.mrf.mxu0 }
 0x2ed   :  { %2188 = vst.msk [vmem:[%s3320_s3 + $0x1c0] sm:$0xff] %vm656_vm3, %v2054_v52 }
 0x2ee   :  { %v1633_v55 = vpop.f32.mrf.mxu1  ;;  %v2058_v56 = vpop.f32.mrf.mxu0 }
 0x2ef   :  { %v2059_v57 = vadd.f32 %v2058_v56, %v1633_v55 }
 0x2f0   :  { %v1635_v58 = vpop.f32.mrf.mxu1  ;;  %v2060_v59 = vpop.f32.mrf.mxu0 }
 0x2f1   :  { %2189 = vst.msk [vmem:[%s3320_s3 + $0x1c8] sm:$0xff] %vm656_vm3, %v2059_v57 }
 0x2f2   :  { %v1638_v60 = vpop.f32.mrf.mxu1  ;;  %v2063_v61 = vpop.f32.mrf.mxu0 }
 0x2f3   :  { %v2064_v62 = vadd.f32 %v2063_v61, %v1638_v60 }
 0x2f4   :  { %v1640_v63 = vpop.f32.mrf.mxu1  ;;  %v2065_v1 = vpop.f32.mrf.mxu0 }
 0x2f5   :  { %2190 = vst.msk [vmem:[%s3320_s3 + $0x1d0] sm:$0xff] %vm656_vm3, %v2064_v62 }
 0x2f6   :  { %v1643_v2 = vpop.f32.mrf.mxu1  ;;  %v2068_v3 = vpop.f32.mrf.mxu0 }
 0x2f7   :  { %v2069_v4 = vadd.f32 %v2068_v3, %v1643_v2 }
 0x2f8   :  { %v1645_v0 = vpop.f32.mrf.mxu1  ;;  %v2070_v5 = vpop.f32.mrf.mxu0 }
 0x2f9   :  { %2191 = vst.msk [vmem:[%s3320_s3 + $0x1d8] sm:$0xff] %vm656_vm3, %v2069_v4 }
 0x2fa   :  { %v1648_v6 = vpop.f32.mrf.mxu1  ;;  %v2073_v7 = vpop.f32.mrf.mxu0 }
 0x2fb   :  { %v2074_v8 = vadd.f32 %v2073_v7, %v1648_v6 }
 0x2fc   :  { %v1650_v9 = vpop.f32.mrf.mxu1  ;;  %v2075_v10 = vpop.f32.mrf.mxu0 }
 0x2fd   :  { %2192 = vst.msk [vmem:[%s3320_s3 + $0x1e0] sm:$0xff] %vm656_vm3, %v2074_v8 }
 0x2fe   :  { %v1653_v11 = vpop.f32.mrf.mxu1  ;;  %v2078_v12 = vpop.f32.mrf.mxu0 }
 0x2ff   :  { %v2079_v13 = vadd.f32 %v2078_v12, %v1653_v11 }
 0x300   :  { %v1655_v14 = vpop.f32.mrf.mxu1  ;;  %v2080_v15 = vpop.f32.mrf.mxu0 }
 0x301   :  { %2193 = vst.msk [vmem:[%s3320_s3 + $0x1e8] sm:$0xff] %vm656_vm3, %v2079_v13 }
 0x302   :  { %v1658_v16 = vpop.f32.mrf.mxu1  ;;  %v2083_v17 = vpop.f32.mrf.mxu0 }
 0x303   :  { %v2084_v18 = vadd.f32 %v2083_v17, %v1658_v16 }
 0x304   :  { %v1660_v19 = vpop.f32.mrf.mxu1  ;;  %v2085_v20 = vpop.f32.mrf.mxu0 }
 0x305   :  { %2194 = vst.msk [vmem:[%s3320_s3 + $0x1f0] sm:$0xff] %vm656_vm3, %v2084_v18 }
 0x306   :  { %v1663_v21 = vpop.f32.mrf.mxu1  ;;  %v2088_v22 = vpop.f32.mrf.mxu0 }
 0x307   :  { %v2089_v23 = vadd.f32 %v2088_v22, %v1663_v21 }
 0x308   :  { %v1665_v24 = vpop.f32.mrf.mxu1  ;;  %v2090_v25 = vpop.f32.mrf.mxu0 }
 0x309   :  { %2195 = vst.msk [vmem:[%s3320_s3 + $0x1f8] sm:$0xff] %vm656_vm3, %v2089_v23 }
 0x30a   :  { %v1668_v26 = vpop.f32.mrf.mxu1  ;;  %v2093_v27 = vpop.f32.mrf.mxu0 }
 0x30b   :  { %v2094_v28 = vadd.f32 %v2093_v27, %v1668_v26 }
 0x30c   :  { %v1670_v29 = vpop.f32.mrf.mxu1  ;;  %v2095_v30 = vpop.f32.mrf.mxu0 }
 0x30d   :  { %2196 = vst.msk [vmem:[%s3320_s3 + $0x200] sm:$0xff] %vm656_vm3, %v2094_v28 }
 0x30e   :  { %v1673_v31 = vpop.f32.mrf.mxu1  ;;  %v2098_v32 = vpop.f32.mrf.mxu0 }
 0x30f   :  { %v2099_v33 = vadd.f32 %v2098_v32, %v1673_v31 }
 0x310   :  { %v1675_v34 = vpop.f32.mrf.mxu1  ;;  %v2100_v35 = vpop.f32.mrf.mxu0 }
 0x311   :  { %2197 = vst.msk [vmem:[%s3320_s3 + $0x208] sm:$0xff] %vm656_vm3, %v2099_v33 }
 0x312   :  { %v1678_v36 = vpop.f32.mrf.mxu1  ;;  %v2103_v37 = vpop.f32.mrf.mxu0 }
 0x313   :  { %v2104_v38 = vadd.f32 %v2103_v37, %v1678_v36 }
 0x314   :  { %v1680_v39 = vpop.f32.mrf.mxu1  ;;  %v2105_v40 = vpop.f32.mrf.mxu0 }
 0x315   :  { %2198 = vst.msk [vmem:[%s3320_s3 + $0x210] sm:$0xff] %vm656_vm3, %v2104_v38 }
 0x316   :  { %v1683_v41 = vpop.f32.mrf.mxu1  ;;  %v2108_v42 = vpop.f32.mrf.mxu0 }
 0x317   :  { %v2109_v43 = vadd.f32 %v2108_v42, %v1683_v41 }
 0x318   :  { %v1685_v44 = vpop.f32.mrf.mxu1  ;;  %v2110_v45 = vpop.f32.mrf.mxu0 }
 0x319   :  { %2199 = vst.msk [vmem:[%s3320_s3 + $0x218] sm:$0xff] %vm656_vm3, %v2109_v43 }
 0x31a   :  { %v1688_v46 = vpop.f32.mrf.mxu1  ;;  %v2113_v47 = vpop.f32.mrf.mxu0 }
 0x31b   :  { %v2114_v48 = vadd.f32 %v2113_v47, %v1688_v46 }
 0x31c   :  { %v1690_v49 = vpop.f32.mrf.mxu1  ;;  %v2115_v50 = vpop.f32.mrf.mxu0 }
 0x31d   :  { %2200 = vst.msk [vmem:[%s3320_s3 + $0x220] sm:$0xff] %vm656_vm3, %v2114_v48 }
 0x31e   :  { %v1693_v51 = vpop.f32.mrf.mxu1  ;;  %v2118_v52 = vpop.f32.mrf.mxu0 }
 0x31f   :  { %v2119_v53 = vadd.f32 %v2118_v52, %v1693_v51 }
 0x320   :  { %v1695_v54 = vpop.f32.mrf.mxu1  ;;  %v2120_v55 = vpop.f32.mrf.mxu0 }
 0x321   :  { %2201 = vst.msk [vmem:[%s3320_s3 + $0x228] sm:$0xff] %vm656_vm3, %v2119_v53 }
 0x322   :  { %v1698_v56 = vpop.f32.mrf.mxu1  ;;  %v2123_v57 = vpop.f32.mrf.mxu0 }
 0x323   :  { %v2124_v58 = vadd.f32 %v2123_v57, %v1698_v56 }
 0x324   :  { %v1700_v59 = vpop.f32.mrf.mxu1  ;;  %v2125_v60 = vpop.f32.mrf.mxu0 }
 0x325   :  { %2202 = vst.msk [vmem:[%s3320_s3 + $0x230] sm:$0xff] %vm656_vm3, %v2124_v58 }
 0x326   :  { %v1703_v61 = vpop.f32.mrf.mxu1  ;;  %v2128_v62 = vpop.f32.mrf.mxu0 }
 0x327   :  { %v2129_v63 = vadd.f32 %v2128_v62, %v1703_v61 }
 0x328   :  { %v1705_v1 = vpop.f32.mrf.mxu1  ;;  %v2130_v2 = vpop.f32.mrf.mxu0 }
 0x329   :  { %2203 = vst.msk [vmem:[%s3320_s3 + $0x238] sm:$0xff] %vm656_vm3, %v2129_v63 }
 0x32a   :  { %2208 = vsyncpa [#allocation4], 1 }
 0x32b   :  { %2209 = vsyncpa [#allocation6], 1 }

</bundles_post_ra>
